<compile_context>
chip_gen: v6e
topology: v6e:2x2x1
jax: 0.10.0
libtpu: 0.0.40
codegen_flags: <defaults>
</compile_context>

<pallas_src>
import functools
import math

import jax
import jax.numpy as jnp
from jax import lax
from jax.experimental import pallas as pl
from jax.experimental.pallas import tpu as pltpu

EPS = 1e-12
_LANE = 128
_SUBLANE_F = 16   # filter-weight sublane packing (bf16 tiles are (16, 128))


def _round_up(n, m):
    return ((n + m - 1) // m) * m


# --------------------------------------------------------------------------------------
# in-kernel helpers
# --------------------------------------------------------------------------------------
def _layernorm(x2d, w, b, real_h, padded_h):
    """LayerNorm matching the PyTorch module (biased variance, eps inside sqrt).

    `x2d` may carry (padded_h - real_h) trailing zero lanes; since those lanes are exactly
    zero, the variance over the real lanes is recovered analytically (no mask needed)."""
    inv_h = 1.0 / real_h
    u = jnp.sum(x2d, axis=-1, keepdims=True) * inv_h
    d = x2d - u
    s = jnp.sum(d * d, axis=-1, keepdims=True)
    if padded_h != real_h:
        s = s - (padded_h - real_h) * (u * u)   # padded lanes contributed (0-u)^2 each
    s = s * inv_h
    return w * (d * lax.rsqrt(s + EPS)) + b


def _lane_tile(a, reps):
    """Tile a (Fp, Hp) array along lanes `reps` times -> (Fp, reps*Hp)."""
    if reps == 1:
        return a
    return jnp.concatenate([a] * reps, axis=1)


def _seq_to_tokens(z, tb, hp):
    """(S, TB*Hp) -> (TB*S, Hp) using 128-aligned lane slices + sublane concat."""
    if tb == 1:
        return z
    return jnp.concatenate([z[:, t * hp:(t + 1) * hp] for t in range(tb)], axis=0)


def _tokens_to_seq(z, seq_len, tb, hp):
    """(TB*S, Hp) -> (S, TB*Hp); inverse of _seq_to_tokens."""
    if tb == 1:
        return z
    return jnp.concatenate([z[t * seq_len:(t + 1) * seq_len, :] for t in range(tb)], axis=1)


# --------------------------------------------------------------------------------------
# kernel
# --------------------------------------------------------------------------------------
def _encoder_kernel(x_ref, c_ref, d_ref, wr_ref, wi_ref,
                    ln1w_ref, ln1b_ref, w1_ref, b1_ref,
                    w2_ref, b2_ref, ln2w_ref, ln2b_ref, out_ref,
                    *, num_layers, batch_tile, f_pad, real_h, padded_h):
    seq_len = x_ref.shape[0]
    cmat = c_ref[...]                      # (2Fp, S)  f32   forward DFT  [Re; Im]
    dmat = d_ref[...]                      # (S, 2Fp)  f32   inverse DFT  [Re | Im]

    def layer(l, x2):
        # ---- FilterLayer: rfft(seq) * complex_weight -> irfft(seq) ----
        # single lane-dense 2D matmul: batch lives in the N dimension (TB*Hp lanes)
        xf = jnp.dot(cmat, x2, preferred_element_type=jnp.float32)    # (2Fp, TB*Hp)
        xre = xf[:f_pad, :]
        xim = xf[f_pad:, :]
        wr = _lane_tile(wr_ref[l].astype(jnp.float32), batch_tile)    # (Fp, TB*Hp)
        wi = _lane_tile(wi_ref[l].astype(jnp.float32), batch_tile)
        yre = xre * wr - xim * wi
        yim = xre * wi + xim * wr
        if 2 * f_pad <= 128:
            # short sequences: fuse [yre; yim] so the inverse DFT is one K-pass
            y = jnp.concatenate([yre, yim], axis=0)                   # (2Fp, TB*Hp)
            seq_fft = jnp.dot(dmat, y, preferred_element_type=jnp.float32)
        else:
            # long sequences: split to avoid materializing the concatenated spectrum
            seq_fft = (jnp.dot(dmat[:, :f_pad], yre, preferred_element_type=jnp.float32)
                       + jnp.dot(dmat[:, f_pad:], yim, preferred_element_type=jnp.float32))

        # dropout == identity (eval mode); residual, then per-token LayerNorm / MLP
        r = _seq_to_tokens(seq_fft + x2, batch_tile, padded_h)        # (TB*S, Hp)
        h = _layernorm(r, ln1w_ref[l], ln1b_ref[l], real_h, padded_h)

        # ---- Intermediate: LayerNorm -> Linear -> ReLU -> Linear -> residual ----
        hn = _layernorm(h, ln2w_ref[l], ln2b_ref[l], real_h, padded_h)
        w1 = w1_ref[l]                                                # (Hp, Ip) bf16
        t = jnp.maximum(
            jnp.dot(hn.astype(w1.dtype), w1, preferred_element_type=jnp.float32)
            + b1_ref[l], 0.0)
        w2 = w2_ref[l]                                                # (Ip, Hp) bf16
        o = jnp.dot(t.astype(w2.dtype), w2, preferred_element_type=jnp.float32) + b2_ref[l]
        return _tokens_to_seq(o + h, seq_len, batch_tile, padded_h)   # (S, TB*Hp)

    x2 = x_ref[...]                                                   # (S, TB*Hp), zero-padded lanes
    if num_layers <= 4:
        for l in range(num_layers):                                   # small L: static unroll
            x2 = layer(l, x2)
    else:                                                             # large L: bound live ranges
        x2 = lax.fori_loop(0, num_layers, layer, x2)
    out_ref[...] = x2


# --------------------------------------------------------------------------------------
# wrapper-side constant preparation
# --------------------------------------------------------------------------------------
def dft_matrices(seq_len, f_pad):
    """Fused, padded DFT matrices reproducing torch.fft.rfft / irfft (dim=1, norm='ortho').

    Returns C (2*f_pad, S) forward [Re; Im] and D (S, 2*f_pad) inverse [Re | Im] with the
    Hermitian doubling (DC/Nyquist counted once, their imaginary parts discarded) folded
    into D.  Rows/cols >= F are zero."""
    S = seq_len
    F = S // 2 + 1
    n = jnp.arange(S, dtype=jnp.float32)
    k = jnp.arange(F, dtype=jnp.float32)
    ang = 2.0 * jnp.pi * k[:, None] * n[None, :] / S            # (F, S)
    scale = 1.0 / jnp.sqrt(jnp.float32(S))
    cr = jnp.cos(ang) * scale
    ci = -jnp.sin(ang) * scale
    a = jnp.ones((F,), jnp.float32).at[1:].set(2.0)
    if S % 2 == 0:
        a = a.at[-1].set(1.0)
    dr = (cr * a[:, None]).T                                    # (S, F)
    di = (ci * a[:, None]).T                                    # (S, F)
    pad_f = f_pad - F
    cr = jnp.pad(cr, ((0, pad_f), (0, 0)))
    ci = jnp.pad(ci, ((0, pad_f), (0, 0)))
    dr = jnp.pad(dr, ((0, 0), (0, pad_f)))
    di = jnp.pad(di, ((0, 0), (0, pad_f)))
    C = jnp.concatenate([cr, ci], axis=0)                       # (2Fp, S)
    D = jnp.concatenate([dr, di], axis=1)                       # (S, 2Fp)
    return C, D


def init_layer_params(key, seq_len, hidden, inter):
    F = seq_len // 2 + 1
    k_cw, k_w1, k_b1, k_w2, k_b2 = jax.random.split(key, 5)
    cw = 0.02 * jax.random.normal(k_cw, (F, hidden, 2), jnp.float32)
    bnd1 = 1.0 / math.sqrt(hidden)
    bnd2 = 1.0 / math.sqrt(inter)
    return dict(
        wr=cw[..., 0],                                          # (F, H)
        wi=cw[..., 1],                                          # (F, H)
        ln1w=jnp.ones((1, hidden), jnp.float32),
        ln1b=jnp.zeros((1, hidden), jnp.float32),
        w1=jax.random.uniform(k_w1, (hidden, inter), jnp.float32, -bnd1, bnd1),
        b1=jax.random.uniform(k_b1, (1, inter), jnp.float32, -bnd1, bnd1),
        w2=jax.random.uniform(k_w2, (inter, hidden), jnp.float32, -bnd2, bnd2),
        b2=jax.random.uniform(k_b2, (1, hidden), jnp.float32, -bnd2, bnd2),
        ln2w=jnp.ones((1, hidden), jnp.float32),
        ln2b=jnp.zeros((1, hidden), jnp.float32),
    )


_PARAM_ORDER = ("wr", "wi", "ln1w", "ln1b", "w1", "b1", "w2", "b2", "ln2w", "ln2b")


def _pad2(a, rows, cols):
    r, c = a.shape
    return jnp.pad(a, ((0, rows - r), (0, cols - c)))


def _pack_params(layers_params, f_pad, h_pad, i_pad):
    """Stack per-layer params with a leading L dim, zero-padding lanes to 128 multiples.
    Big weights are stored in bf16; LN params/biases stay f32.  Padded LN weight/bias and
    bias lanes are zero so padded output lanes stay exactly zero (required by _layernorm)."""
    specs = dict(
        wr=((f_pad, h_pad), jnp.bfloat16), wi=((f_pad, h_pad), jnp.bfloat16),
        ln1w=((1, h_pad), jnp.float32),    ln1b=((1, h_pad), jnp.float32),
        w1=((h_pad, i_pad), jnp.bfloat16), b1=((1, i_pad), jnp.float32),
        w2=((i_pad, h_pad), jnp.bfloat16), b2=((1, h_pad), jnp.float32),
        ln2w=((1, h_pad), jnp.float32),    ln2b=((1, h_pad), jnp.float32),
    )
    out = {}
    for name in _PARAM_ORDER:
        (rows, cols), dt = specs[name]
        out[name] = jnp.stack([_pad2(p[name], rows, cols) for p in layers_params]).astype(dt)
    return out


def _choose_batch_tile(batch, seq_len, target_tokens=512, min_steps=2):
    # Aim for ~512 tokens per grid step so the MLP matmuls fill the MXU, while keeping
    # >= 2 grid steps when the batch allows (megacore sharding / DMA-compute overlap).
    tb = max(1, min(batch, target_tokens // max(seq_len, 1)))
    while batch % tb:
        tb -= 1
    while batch // tb < min_steps and tb > 1:
        tb = max(1, tb // 2)
        while batch % tb:
            tb -= 1
    return tb


# --------------------------------------------------------------------------------------
# public forward
# --------------------------------------------------------------------------------------
def encoder_forward(x, layers_params, *, single_buffer_consts=True):
    B, S, H = x.shape
    L = len(layers_params)
    I = layers_params[0]["w1"].shape[1]
    F = S // 2 + 1
    Fp = _round_up(F, _SUBLANE_F)
    Hp = _round_up(H, _LANE)
    Ip = _round_up(I, _LANE)
    TB = _choose_batch_tile(B, S)
    TBH = TB * Hp

    C, D = dft_matrices(S, Fp)                                  # f32, 2D (no per-batch broadcast)
    packed = _pack_params(layers_params, Fp, Hp, Ip)
    const_args = (C, D) + tuple(packed[k] for k in _PARAM_ORDER)

    # Seq-major, lane-dense activation layout (S, B*Hp): one XLA copy in, one out.
    if Hp != H:
        x = jnp.pad(x, ((0, 0), (0, 0), (0, Hp - H)))
    x2 = jnp.transpose(x, (1, 0, 2)).reshape(S, B * Hp)

    const_kw = dict(pipeline_mode=pl.Buffered(1)) if single_buffer_consts else {}
    in_specs = [pl.BlockSpec((S, TBH), lambda g: (0, g))]
    in_specs += [pl.BlockSpec(a.shape, lambda g, _n=a.ndim: (0,) * _n, **const_kw)
                 for a in const_args]
    out_spec = pl.BlockSpec((S, TBH), lambda g: (0, g))

    kernel = functools.partial(_encoder_kernel, num_layers=L, batch_tile=TB,
                               f_pad=Fp, real_h=H, padded_h=Hp)

    # advisory cost hint for XLA's scheduler
    tokens = B * S
    const_bytes = sum(int(a.size) * a.dtype.itemsize for a in const_args)
    flops = L * (4 * (2 * Fp) * S * B * Hp        # forward + inverse DFT matmuls
                 + 8 * Fp * B * Hp                # complex filter multiply
                 + 4 * tokens * Hp * Ip           # two MLP matmuls
                 + 24 * tokens * Hp)              # LayerNorms, residuals, relayouts
    cost = pl.CostEstimate(flops=int(flops), transcendentals=int(2 * L * tokens),
                           bytes_accessed=int(2 * 4 * S * B * Hp + const_bytes))

    # VMEM budget: single-buffered constants + double-buffered activation block + working set,
    # clamped to the chip's physical VMEM (generation-aware).
    act_bytes = 4 * S * TBH
    buf = 1 if single_buffer_consts else 2
    need = (buf * const_bytes + 4 * act_bytes + 10 * act_bytes
            + 8 * Fp * TBH * 4 + (4 << 20))
    try:
        cap = int(pltpu.get_tpu_info().vmem_capacity_bytes) - (16 << 20)
    except Exception:
        cap = 96 << 20
    vmem_limit = int(max(min(need, cap), 16 << 20))

    out2 = pl.pallas_call(
        kernel,
        out_shape=jax.ShapeDtypeStruct((S, B * Hp), jnp.float32),
        grid_spec=pltpu.PrefetchScalarGridSpec(
            num_scalar_prefetch=0,
            grid=(B // TB,),
            in_specs=in_specs,
            out_specs=out_spec,
        ),
        compiler_params=pltpu.CompilerParams(
            dimension_semantics=("parallel",),
            vmem_limit_bytes=vmem_limit),
        cost_estimate=cost,
    )(x2, *const_args)

    out = out2.reshape(S, B, Hp).transpose(1, 0, 2)
    return out[:, :, :H] if Hp != H else out


# --------------------------------------------------------------------------------------
# pure-JAX reference (independent: real FFT path) for a sanity check
# --------------------------------------------------------------------------------------
def _ref_layernorm(x, w, b):
    u = jnp.mean(x, axis=-1, keepdims=True)
    s = jnp.mean((x - u) * (x - u), axis=-1, keepdims=True)
    return w * ((x - u) / jnp.sqrt(s + EPS)) + b


def ref_forward(x, layers_params):
    for p in layers_params:
        S = x.shape[1]
        xf = jnp.fft.rfft(x, axis=1, norm="ortho")
        xf = xf * (p["wr"] + 1j * p["wi"])[None]
        seq = jnp.fft.irfft(xf, n=S, axis=1, norm="ortho")
        h = _ref_layernorm(seq + x, p["ln1w"][0], p["ln1b"][0])
        hn = _ref_layernorm(h, p["ln2w"][0], p["ln2b"][0])
        t = jnp.maximum(hn @ p["w1"] + p["b1"][0], 0.0)
        o = t @ p["w2"] + p["b2"][0]
        x = o + h
    return x


if __name__ == "__main__":
    # small config consistent with the module: max_seq_length=8, hidden_size=32,
    # intermediate_size=64, num_hidden_layers=2, batch=2
    B, S, H, I, L = 2, 8, 32, 64, 2

    root = jax.random.PRNGKey(0)
    k_x, k_p = jax.random.split(root)
    x = jax.random.normal(k_x, (B, S, H), jnp.float32)
    layer_keys = jax.random.split(k_p, L)
    layers_params = [init_layer_params(layer_keys[i], S, H, I) for i in range(L)]

    try:
        fwd = jax.jit(functools.partial(encoder_forward, single_buffer_consts=True))
        out = jax.block_until_ready(fwd(x, layers_params))
    except Exception:
        # fallback if this jax build rejects pipeline_mode=pl.Buffered(1) on the constants
        fwd = jax.jit(functools.partial(encoder_forward, single_buffer_consts=False))
        out = jax.block_until_ready(fwd(x, layers_params))

    ref = jax.block_until_ready(ref_forward(x, layers_params))

    abs_err = float(jnp.max(jnp.abs(out - ref)))
    rel_err = float(jnp.linalg.norm(out - ref) / jnp.linalg.norm(ref))
    # MLP/filter weights are stored in bf16 and the MXU accumulates in f32 -> allow a few e-2.
    assert out.shape == (B, S, H), f"bad shape {out.shape}"
    assert abs_err < 5e-2 and rel_err < 2e-2, f"mismatch: abs {abs_err} rel {rel_err}"
    print("KERNEL_OK")
</pallas_src>

<mosaic_0001>
module attributes {stable_mosaic.version = 11 : i64} {
  func.func @_encoder_kernel(%arg0: i32, %arg1: memref<8x128xf32, #tpu.memory_space<vmem>>, %arg2: memref<32x8xf32, #tpu.memory_space<vmem>>, %arg3: memref<8x32xf32, #tpu.memory_space<vmem>>, %arg4: memref<2x16x128xbf16, #tpu.memory_space<vmem>>, %arg5: memref<2x16x128xbf16, #tpu.memory_space<vmem>>, %arg6: memref<2x1x128xf32, #tpu.memory_space<vmem>>, %arg7: memref<2x1x128xf32, #tpu.memory_space<vmem>>, %arg8: memref<2x128x128xbf16, #tpu.memory_space<vmem>>, %arg9: memref<2x1x128xf32, #tpu.memory_space<vmem>>, %arg10: memref<2x128x128xbf16, #tpu.memory_space<vmem>>, %arg11: memref<2x1x128xf32, #tpu.memory_space<vmem>>, %arg12: memref<2x1x128xf32, #tpu.memory_space<vmem>>, %arg13: memref<2x1x128xf32, #tpu.memory_space<vmem>>, %arg14: memref<8x128xf32, #tpu.memory_space<vmem>>) attributes {dimension_semantics = [#tpu.dimension_semantics<parallel>], iteration_bounds = array<i64: 2>, scalar_prefetch = 0 : i64, scratch_operands = 0 : i64, tpu.core_type = #tpu.core_type<tc>, window_params = [{transform_indices = @transform_0, window_bounds = array<i64: 8, 128>}, {pipeline_mode = #tpu.pipeline_mode<synchronous>, transform_indices = @transform_1, window_bounds = array<i64: 32, 8>}, {pipeline_mode = #tpu.pipeline_mode<synchronous>, transform_indices = @transform_2, window_bounds = array<i64: 8, 32>}, {pipeline_mode = #tpu.pipeline_mode<synchronous>, transform_indices = @transform_3, window_bounds = array<i64: 2, 16, 128>}, {pipeline_mode = #tpu.pipeline_mode<synchronous>, transform_indices = @transform_4, window_bounds = array<i64: 2, 16, 128>}, {pipeline_mode = #tpu.pipeline_mode<synchronous>, transform_indices = @transform_5, window_bounds = array<i64: 2, 1, 128>}, {pipeline_mode = #tpu.pipeline_mode<synchronous>, transform_indices = @transform_6, window_bounds = array<i64: 2, 1, 128>}, {pipeline_mode = #tpu.pipeline_mode<synchronous>, transform_indices = @transform_7, window_bounds = array<i64: 2, 128, 128>}, {pipeline_mode = #tpu.pipeline_mode<synchronous>, transform_indices = @transform_8, window_bounds = array<i64: 2, 1, 128>}, {pipeline_mode = #tpu.pipeline_mode<synchronous>, transform_indices = @transform_9, window_bounds = array<i64: 2, 128, 128>}, {pipeline_mode = #tpu.pipeline_mode<synchronous>, transform_indices = @transform_10, window_bounds = array<i64: 2, 1, 128>}, {pipeline_mode = #tpu.pipeline_mode<synchronous>, transform_indices = @transform_11, window_bounds = array<i64: 2, 1, 128>}, {pipeline_mode = #tpu.pipeline_mode<synchronous>, transform_indices = @transform_12, window_bounds = array<i64: 2, 1, 128>}, {transform_indices = @transform_13, window_bounds = array<i64: 8, 128>}]} {
    %c0 = arith.constant 0 : index
    %c0_0 = arith.constant 0 : index
    %0 = vector.load %arg2[%c0, %c0_0] : memref<32x8xf32, #tpu.memory_space<vmem>>, vector<32x8xf32>
    %c0_1 = arith.constant 0 : index
    %c0_2 = arith.constant 0 : index
    %1 = vector.load %arg3[%c0_1, %c0_2] : memref<8x32xf32, #tpu.memory_space<vmem>>, vector<8x32xf32>
    %c0_3 = arith.constant 0 : index
    %c0_4 = arith.constant 0 : index
    %2 = vector.load %arg1[%c0_3, %c0_4] : memref<8x128xf32, #tpu.memory_space<vmem>>, vector<8x128xf32>
    %cst = arith.constant dense<0.000000e+00> : vector<32x128xf32>
    %3 = tpu.matmul %0, %2, %cst {dimension_numbers = #tpu.dot_dimension_numbers<[1], [0], [0], [1], [0, 0, 1, 1], [], []>} : vector<32x8xf32>, vector<8x128xf32>, vector<32x128xf32> -> vector<32x128xf32>
    %4 = vector.extract_strided_slice %3 {offsets = [0, 0], sizes = [16, 128], strides = [1, 1]} : vector<32x128xf32> to vector<16x128xf32>
    %5 = vector.extract_strided_slice %3 {offsets = [16, 0], sizes = [16, 128], strides = [1, 1]} : vector<32x128xf32> to vector<16x128xf32>
    %c0_5 = arith.constant 0 : index
    %c0_6 = arith.constant 0 : index
    %c0_7 = arith.constant 0 : index
    %6 = vector.load %arg4[%c0_5, %c0_6, %c0_7] : memref<2x16x128xbf16, #tpu.memory_space<vmem>>, vector<1x16x128xbf16>
    %7 = vector.shape_cast %6 : vector<1x16x128xbf16> to vector<16x128xbf16>
    %8 = arith.extf %7 : vector<16x128xbf16> to vector<16x128xf32>
    %c0_8 = arith.constant 0 : index
    %c0_9 = arith.constant 0 : index
    %c0_10 = arith.constant 0 : index
    %9 = vector.load %arg5[%c0_8, %c0_9, %c0_10] : memref<2x16x128xbf16, #tpu.memory_space<vmem>>, vector<1x16x128xbf16>
    %10 = vector.shape_cast %9 : vector<1x16x128xbf16> to vector<16x128xbf16>
    %11 = arith.extf %10 : vector<16x128xbf16> to vector<16x128xf32>
    %12 = arith.mulf %4, %8 : vector<16x128xf32>
    %13 = arith.mulf %5, %11 : vector<16x128xf32>
    %14 = arith.subf %12, %13 : vector<16x128xf32>
    %15 = arith.mulf %4, %11 : vector<16x128xf32>
    %16 = arith.mulf %5, %8 : vector<16x128xf32>
    %17 = arith.addf %15, %16 : vector<16x128xf32>
    %18 = tpu.concatenate %14, %17 in 0 : vector<16x128xf32>, vector<16x128xf32> -> vector<32x128xf32>
    %cst_11 = arith.constant dense<0.000000e+00> : vector<8x128xf32>
    %19 = tpu.matmul %1, %18, %cst_11 {dimension_numbers = #tpu.dot_dimension_numbers<[1], [0], [0], [1], [0, 0, 1, 1], [], []>} : vector<8x32xf32>, vector<32x128xf32>, vector<8x128xf32> -> vector<8x128xf32>
    %20 = arith.addf %19, %2 : vector<8x128xf32>
    %c0_12 = arith.constant 0 : index
    %c0_13 = arith.constant 0 : index
    %c0_14 = arith.constant 0 : index
    %21 = vector.load %arg6[%c0_12, %c0_13, %c0_14] : memref<2x1x128xf32, #tpu.memory_space<vmem>>, vector<1x1x128xf32>
    %22 = vector.shape_cast %21 : vector<1x1x128xf32> to vector<1x128xf32>
    %c0_15 = arith.constant 0 : index
    %c0_16 = arith.constant 0 : index
    %c0_17 = arith.constant 0 : index
    %23 = vector.load %arg7[%c0_15, %c0_16, %c0_17] : memref<2x1x128xf32, #tpu.memory_space<vmem>>, vector<1x1x128xf32>
    %24 = vector.shape_cast %23 : vector<1x1x128xf32> to vector<1x128xf32>
    %cst_18 = arith.constant dense<0.000000e+00> : vector<8xf32>
    %25 = vector.multi_reduction <add>, %20, %cst_18 [1] : vector<8x128xf32> to vector<8xf32>
    %26 = vector.shape_cast %25 : vector<8xf32> to vector<8x1xf32>
    %cst_19 = arith.constant 3.125000e-02 : f32
    %27 = vector.broadcast %cst_19 : f32 to vector<8x1xf32>
    %28 = arith.mulf %26, %27 : vector<8x1xf32>
    %29 = vector.broadcast %28 : vector<8x1xf32> to vector<8x128xf32>
    %30 = arith.subf %20, %29 : vector<8x128xf32>
    %31 = arith.mulf %30, %30 : vector<8x128xf32>
    %cst_20 = arith.constant dense<0.000000e+00> : vector<8xf32>
    %32 = vector.multi_reduction <add>, %31, %cst_20 [1] : vector<8x128xf32> to vector<8xf32>
    %33 = vector.shape_cast %32 : vector<8xf32> to vector<8x1xf32>
    %34 = arith.mulf %28, %28 : vector<8x1xf32>
    %cst_21 = arith.constant 9.600000e+01 : f32
    %35 = vector.broadcast %cst_21 : f32 to vector<8x1xf32>
    %36 = arith.mulf %35, %34 : vector<8x1xf32>
    %37 = arith.subf %33, %36 : vector<8x1xf32>
    %cst_22 = arith.constant 3.125000e-02 : f32
    %38 = vector.broadcast %cst_22 : f32 to vector<8x1xf32>
    %39 = arith.mulf %37, %38 : vector<8x1xf32>
    %cst_23 = arith.constant 9.99999996E-13 : f32
    %40 = vector.broadcast %cst_23 : f32 to vector<8x1xf32>
    %41 = arith.addf %39, %40 : vector<8x1xf32>
    %42 = math.rsqrt %41 : vector<8x1xf32>
    %43 = vector.broadcast %42 : vector<8x1xf32> to vector<8x128xf32>
    %44 = arith.mulf %30, %43 : vector<8x128xf32>
    %45 = vector.broadcast %22 : vector<1x128xf32> to vector<8x128xf32>
    %46 = arith.mulf %45, %44 : vector<8x128xf32>
    %47 = vector.broadcast %24 : vector<1x128xf32> to vector<8x128xf32>
    %48 = arith.addf %46, %47 : vector<8x128xf32>
    %c0_24 = arith.constant 0 : index
    %c0_25 = arith.constant 0 : index
    %c0_26 = arith.constant 0 : index
    %49 = vector.load %arg12[%c0_24, %c0_25, %c0_26] : memref<2x1x128xf32, #tpu.memory_space<vmem>>, vector<1x1x128xf32>
    %50 = vector.shape_cast %49 : vector<1x1x128xf32> to vector<1x128xf32>
    %c0_27 = arith.constant 0 : index
    %c0_28 = arith.constant 0 : index
    %c0_29 = arith.constant 0 : index
    %51 = vector.load %arg13[%c0_27, %c0_28, %c0_29] : memref<2x1x128xf32, #tpu.memory_space<vmem>>, vector<1x1x128xf32>
    %52 = vector.shape_cast %51 : vector<1x1x128xf32> to vector<1x128xf32>
    %cst_30 = arith.constant dense<0.000000e+00> : vector<8xf32>
    %53 = vector.multi_reduction <add>, %48, %cst_30 [1] : vector<8x128xf32> to vector<8xf32>
    %54 = vector.shape_cast %53 : vector<8xf32> to vector<8x1xf32>
    %cst_31 = arith.constant 3.125000e-02 : f32
    %55 = vector.broadcast %cst_31 : f32 to vector<8x1xf32>
    %56 = arith.mulf %54, %55 : vector<8x1xf32>
    %57 = vector.broadcast %56 : vector<8x1xf32> to vector<8x128xf32>
    %58 = arith.subf %48, %57 : vector<8x128xf32>
    %59 = arith.mulf %58, %58 : vector<8x128xf32>
    %cst_32 = arith.constant dense<0.000000e+00> : vector<8xf32>
    %60 = vector.multi_reduction <add>, %59, %cst_32 [1] : vector<8x128xf32> to vector<8xf32>
    %61 = vector.shape_cast %60 : vector<8xf32> to vector<8x1xf32>
    %62 = arith.mulf %56, %56 : vector<8x1xf32>
    %cst_33 = arith.constant 9.600000e+01 : f32
    %63 = vector.broadcast %cst_33 : f32 to vector<8x1xf32>
    %64 = arith.mulf %63, %62 : vector<8x1xf32>
    %65 = arith.subf %61, %64 : vector<8x1xf32>
    %cst_34 = arith.constant 3.125000e-02 : f32
    %66 = vector.broadcast %cst_34 : f32 to vector<8x1xf32>
    %67 = arith.mulf %65, %66 : vector<8x1xf32>
    %cst_35 = arith.constant 9.99999996E-13 : f32
    %68 = vector.broadcast %cst_35 : f32 to vector<8x1xf32>
    %69 = arith.addf %67, %68 : vector<8x1xf32>
    %70 = math.rsqrt %69 : vector<8x1xf32>
    %71 = vector.broadcast %70 : vector<8x1xf32> to vector<8x128xf32>
    %72 = arith.mulf %58, %71 : vector<8x128xf32>
    %73 = vector.broadcast %50 : vector<1x128xf32> to vector<8x128xf32>
    %74 = arith.mulf %73, %72 : vector<8x128xf32>
    %75 = vector.broadcast %52 : vector<1x128xf32> to vector<8x128xf32>
    %76 = arith.addf %74, %75 : vector<8x128xf32>
    %c0_36 = arith.constant 0 : index
    %c0_37 = arith.constant 0 : index
    %c0_38 = arith.constant 0 : index
    %77 = vector.load %arg8[%c0_36, %c0_37, %c0_38] : memref<2x128x128xbf16, #tpu.memory_space<vmem>>, vector<1x128x128xbf16>
    %78 = vector.shape_cast %77 : vector<1x128x128xbf16> to vector<128x128xbf16>
    %79 = arith.truncf %76 : vector<8x128xf32> to vector<8x128xbf16>
    %cst_39 = arith.constant dense<0.000000e+00> : vector<8x128xf32>
    %80 = tpu.matmul %79, %78, %cst_39 {dimension_numbers = #tpu.dot_dimension_numbers<[1], [0], [0], [1], [0, 0, 1, 1], [], []>} : vector<8x128xbf16>, vector<128x128xbf16>, vector<8x128xf32> -> vector<8x128xf32>
    %c0_40 = arith.constant 0 : index
    %c0_41 = arith.constant 0 : index
    %c0_42 = arith.constant 0 : index
    %81 = vector.load %arg9[%c0_40, %c0_41, %c0_42] : memref<2x1x128xf32, #tpu.memory_space<vmem>>, vector<1x1x128xf32>
    %82 = vector.shape_cast %81 : vector<1x1x128xf32> to vector<1x128xf32>
    %83 = vector.broadcast %82 : vector<1x128xf32> to vector<8x128xf32>
    %84 = arith.addf %80, %83 : vector<8x128xf32>
    %cst_43 = arith.constant 0.000000e+00 : f32
    %85 = vector.broadcast %cst_43 : f32 to vector<8x128xf32>
    %86 = arith.maximumf %84, %85 : vector<8x128xf32>
    %c0_44 = arith.constant 0 : index
    %c0_45 = arith.constant 0 : index
    %c0_46 = arith.constant 0 : index
    %87 = vector.load %arg10[%c0_44, %c0_45, %c0_46] : memref<2x128x128xbf16, #tpu.memory_space<vmem>>, vector<1x128x128xbf16>
    %88 = vector.shape_cast %87 : vector<1x128x128xbf16> to vector<128x128xbf16>
    %89 = arith.truncf %86 : vector<8x128xf32> to vector<8x128xbf16>
    %cst_47 = arith.constant dense<0.000000e+00> : vector<8x128xf32>
    %90 = tpu.matmul %89, %88, %cst_47 {dimension_numbers = #tpu.dot_dimension_numbers<[1], [0], [0], [1], [0, 0, 1, 1], [], []>} : vector<8x128xbf16>, vector<128x128xbf16>, vector<8x128xf32> -> vector<8x128xf32>
    %c0_48 = arith.constant 0 : index
    %c0_49 = arith.constant 0 : index
    %c0_50 = arith.constant 0 : index
    %91 = vector.load %arg11[%c0_48, %c0_49, %c0_50] : memref<2x1x128xf32, #tpu.memory_space<vmem>>, vector<1x1x128xf32>
    %92 = vector.shape_cast %91 : vector<1x1x128xf32> to vector<1x128xf32>
    %93 = vector.broadcast %92 : vector<1x128xf32> to vector<8x128xf32>
    %94 = arith.addf %90, %93 : vector<8x128xf32>
    %95 = arith.addf %94, %48 : vector<8x128xf32>
    %cst_51 = arith.constant dense<0.000000e+00> : vector<32x128xf32>
    %96 = tpu.matmul %0, %95, %cst_51 {dimension_numbers = #tpu.dot_dimension_numbers<[1], [0], [0], [1], [0, 0, 1, 1], [], []>} : vector<32x8xf32>, vector<8x128xf32>, vector<32x128xf32> -> vector<32x128xf32>
    %97 = vector.extract_strided_slice %96 {offsets = [0, 0], sizes = [16, 128], strides = [1, 1]} : vector<32x128xf32> to vector<16x128xf32>
    %98 = vector.extract_strided_slice %96 {offsets = [16, 0], sizes = [16, 128], strides = [1, 1]} : vector<32x128xf32> to vector<16x128xf32>
    %c1 = arith.constant 1 : index
    %c0_52 = arith.constant 0 : index
    %c0_53 = arith.constant 0 : index
    %99 = vector.load %arg4[%c1, %c0_52, %c0_53] : memref<2x16x128xbf16, #tpu.memory_space<vmem>>, vector<1x16x128xbf16>
    %100 = vector.shape_cast %99 : vector<1x16x128xbf16> to vector<16x128xbf16>
    %101 = arith.extf %100 : vector<16x128xbf16> to vector<16x128xf32>
    %c1_54 = arith.constant 1 : index
    %c0_55 = arith.constant 0 : index
    %c0_56 = arith.constant 0 : index
    %102 = vector.load %arg5[%c1_54, %c0_55, %c0_56] : memref<2x16x128xbf16, #tpu.memory_space<vmem>>, vector<1x16x128xbf16>
    %103 = vector.shape_cast %102 : vector<1x16x128xbf16> to vector<16x128xbf16>
    %104 = arith.extf %103 : vector<16x128xbf16> to vector<16x128xf32>
    %105 = arith.mulf %97, %101 : vector<16x128xf32>
    %106 = arith.mulf %98, %104 : vector<16x128xf32>
    %107 = arith.subf %105, %106 : vector<16x128xf32>
    %108 = arith.mulf %97, %104 : vector<16x128xf32>
    %109 = arith.mulf %98, %101 : vector<16x128xf32>
    %110 = arith.addf %108, %109 : vector<16x128xf32>
    %111 = tpu.concatenate %107, %110 in 0 : vector<16x128xf32>, vector<16x128xf32> -> vector<32x128xf32>
    %cst_57 = arith.constant dense<0.000000e+00> : vector<8x128xf32>
    %112 = tpu.matmul %1, %111, %cst_57 {dimension_numbers = #tpu.dot_dimension_numbers<[1], [0], [0], [1], [0, 0, 1, 1], [], []>} : vector<8x32xf32>, vector<32x128xf32>, vector<8x128xf32> -> vector<8x128xf32>
    %113 = arith.addf %112, %95 : vector<8x128xf32>
    %c1_58 = arith.constant 1 : index
    %c0_59 = arith.constant 0 : index
    %c0_60 = arith.constant 0 : index
    %114 = vector.load %arg6[%c1_58, %c0_59, %c0_60] : memref<2x1x128xf32, #tpu.memory_space<vmem>>, vector<1x1x128xf32>
    %115 = vector.shape_cast %114 : vector<1x1x128xf32> to vector<1x128xf32>
    %c1_61 = arith.constant 1 : index
    %c0_62 = arith.constant 0 : index
    %c0_63 = arith.constant 0 : index
    %116 = vector.load %arg7[%c1_61, %c0_62, %c0_63] : memref<2x1x128xf32, #tpu.memory_space<vmem>>, vector<1x1x128xf32>
    %117 = vector.shape_cast %116 : vector<1x1x128xf32> to vector<1x128xf32>
    %cst_64 = arith.constant dense<0.000000e+00> : vector<8xf32>
    %118 = vector.multi_reduction <add>, %113, %cst_64 [1] : vector<8x128xf32> to vector<8xf32>
    %119 = vector.shape_cast %118 : vector<8xf32> to vector<8x1xf32>
    %cst_65 = arith.constant 3.125000e-02 : f32
    %120 = vector.broadcast %cst_65 : f32 to vector<8x1xf32>
    %121 = arith.mulf %119, %120 : vector<8x1xf32>
    %122 = vector.broadcast %121 : vector<8x1xf32> to vector<8x128xf32>
    %123 = arith.subf %113, %122 : vector<8x128xf32>
    %124 = arith.mulf %123, %123 : vector<8x128xf32>
    %cst_66 = arith.constant dense<0.000000e+00> : vector<8xf32>
    %125 = vector.multi_reduction <add>, %124, %cst_66 [1] : vector<8x128xf32> to vector<8xf32>
    %126 = vector.shape_cast %125 : vector<8xf32> to vector<8x1xf32>
    %127 = arith.mulf %121, %121 : vector<8x1xf32>
    %cst_67 = arith.constant 9.600000e+01 : f32
    %128 = vector.broadcast %cst_67 : f32 to vector<8x1xf32>
    %129 = arith.mulf %128, %127 : vector<8x1xf32>
    %130 = arith.subf %126, %129 : vector<8x1xf32>
    %cst_68 = arith.constant 3.125000e-02 : f32
    %131 = vector.broadcast %cst_68 : f32 to vector<8x1xf32>
    %132 = arith.mulf %130, %131 : vector<8x1xf32>
    %cst_69 = arith.constant 9.99999996E-13 : f32
    %133 = vector.broadcast %cst_69 : f32 to vector<8x1xf32>
    %134 = arith.addf %132, %133 : vector<8x1xf32>
    %135 = math.rsqrt %134 : vector<8x1xf32>
    %136 = vector.broadcast %135 : vector<8x1xf32> to vector<8x128xf32>
    %137 = arith.mulf %123, %136 : vector<8x128xf32>
    %138 = vector.broadcast %115 : vector<1x128xf32> to vector<8x128xf32>
    %139 = arith.mulf %138, %137 : vector<8x128xf32>
    %140 = vector.broadcast %117 : vector<1x128xf32> to vector<8x128xf32>
    %141 = arith.addf %139, %140 : vector<8x128xf32>
    %c1_70 = arith.constant 1 : index
    %c0_71 = arith.constant 0 : index
    %c0_72 = arith.constant 0 : index
    %142 = vector.load %arg12[%c1_70, %c0_71, %c0_72] : memref<2x1x128xf32, #tpu.memory_space<vmem>>, vector<1x1x128xf32>
    %143 = vector.shape_cast %142 : vector<1x1x128xf32> to vector<1x128xf32>
    %c1_73 = arith.constant 1 : index
    %c0_74 = arith.constant 0 : index
    %c0_75 = arith.constant 0 : index
    %144 = vector.load %arg13[%c1_73, %c0_74, %c0_75] : memref<2x1x128xf32, #tpu.memory_space<vmem>>, vector<1x1x128xf32>
    %145 = vector.shape_cast %144 : vector<1x1x128xf32> to vector<1x128xf32>
    %cst_76 = arith.constant dense<0.000000e+00> : vector<8xf32>
    %146 = vector.multi_reduction <add>, %141, %cst_76 [1] : vector<8x128xf32> to vector<8xf32>
    %147 = vector.shape_cast %146 : vector<8xf32> to vector<8x1xf32>
    %cst_77 = arith.constant 3.125000e-02 : f32
    %148 = vector.broadcast %cst_77 : f32 to vector<8x1xf32>
    %149 = arith.mulf %147, %148 : vector<8x1xf32>
    %150 = vector.broadcast %149 : vector<8x1xf32> to vector<8x128xf32>
    %151 = arith.subf %141, %150 : vector<8x128xf32>
    %152 = arith.mulf %151, %151 : vector<8x128xf32>
    %cst_78 = arith.constant dense<0.000000e+00> : vector<8xf32>
    %153 = vector.multi_reduction <add>, %152, %cst_78 [1] : vector<8x128xf32> to vector<8xf32>
    %154 = vector.shape_cast %153 : vector<8xf32> to vector<8x1xf32>
    %155 = arith.mulf %149, %149 : vector<8x1xf32>
    %cst_79 = arith.constant 9.600000e+01 : f32
    %156 = vector.broadcast %cst_79 : f32 to vector<8x1xf32>
    %157 = arith.mulf %156, %155 : vector<8x1xf32>
    %158 = arith.subf %154, %157 : vector<8x1xf32>
    %cst_80 = arith.constant 3.125000e-02 : f32
    %159 = vector.broadcast %cst_80 : f32 to vector<8x1xf32>
    %160 = arith.mulf %158, %159 : vector<8x1xf32>
    %cst_81 = arith.constant 9.99999996E-13 : f32
    %161 = vector.broadcast %cst_81 : f32 to vector<8x1xf32>
    %162 = arith.addf %160, %161 : vector<8x1xf32>
    %163 = math.rsqrt %162 : vector<8x1xf32>
    %164 = vector.broadcast %163 : vector<8x1xf32> to vector<8x128xf32>
    %165 = arith.mulf %151, %164 : vector<8x128xf32>
    %166 = vector.broadcast %143 : vector<1x128xf32> to vector<8x128xf32>
    %167 = arith.mulf %166, %165 : vector<8x128xf32>
    %168 = vector.broadcast %145 : vector<1x128xf32> to vector<8x128xf32>
    %169 = arith.addf %167, %168 : vector<8x128xf32>
    %c1_82 = arith.constant 1 : index
    %c0_83 = arith.constant 0 : index
    %c0_84 = arith.constant 0 : index
    %170 = vector.load %arg8[%c1_82, %c0_83, %c0_84] : memref<2x128x128xbf16, #tpu.memory_space<vmem>>, vector<1x128x128xbf16>
    %171 = vector.shape_cast %170 : vector<1x128x128xbf16> to vector<128x128xbf16>
    %172 = arith.truncf %169 : vector<8x128xf32> to vector<8x128xbf16>
    %cst_85 = arith.constant dense<0.000000e+00> : vector<8x128xf32>
    %173 = tpu.matmul %172, %171, %cst_85 {dimension_numbers = #tpu.dot_dimension_numbers<[1], [0], [0], [1], [0, 0, 1, 1], [], []>} : vector<8x128xbf16>, vector<128x128xbf16>, vector<8x128xf32> -> vector<8x128xf32>
    %c1_86 = arith.constant 1 : index
    %c0_87 = arith.constant 0 : index
    %c0_88 = arith.constant 0 : index
    %174 = vector.load %arg9[%c1_86, %c0_87, %c0_88] : memref<2x1x128xf32, #tpu.memory_space<vmem>>, vector<1x1x128xf32>
    %175 = vector.shape_cast %174 : vector<1x1x128xf32> to vector<1x128xf32>
    %176 = vector.broadcast %175 : vector<1x128xf32> to vector<8x128xf32>
    %177 = arith.addf %173, %176 : vector<8x128xf32>
    %cst_89 = arith.constant 0.000000e+00 : f32
    %178 = vector.broadcast %cst_89 : f32 to vector<8x128xf32>
    %179 = arith.maximumf %177, %178 : vector<8x128xf32>
    %c1_90 = arith.constant 1 : index
    %c0_91 = arith.constant 0 : index
    %c0_92 = arith.constant 0 : index
    %180 = vector.load %arg10[%c1_90, %c0_91, %c0_92] : memref<2x128x128xbf16, #tpu.memory_space<vmem>>, vector<1x128x128xbf16>
    %181 = vector.shape_cast %180 : vector<1x128x128xbf16> to vector<128x128xbf16>
    %182 = arith.truncf %179 : vector<8x128xf32> to vector<8x128xbf16>
    %cst_93 = arith.constant dense<0.000000e+00> : vector<8x128xf32>
    %183 = tpu.matmul %182, %181, %cst_93 {dimension_numbers = #tpu.dot_dimension_numbers<[1], [0], [0], [1], [0, 0, 1, 1], [], []>} : vector<8x128xbf16>, vector<128x128xbf16>, vector<8x128xf32> -> vector<8x128xf32>
    %c1_94 = arith.constant 1 : index
    %c0_95 = arith.constant 0 : index
    %c0_96 = arith.constant 0 : index
    %184 = vector.load %arg11[%c1_94, %c0_95, %c0_96] : memref<2x1x128xf32, #tpu.memory_space<vmem>>, vector<1x1x128xf32>
    %185 = vector.shape_cast %184 : vector<1x1x128xf32> to vector<1x128xf32>
    %186 = vector.broadcast %185 : vector<1x128xf32> to vector<8x128xf32>
    %187 = arith.addf %183, %186 : vector<8x128xf32>
    %188 = arith.addf %187, %141 : vector<8x128xf32>
    %c0_97 = arith.constant 0 : index
    %c0_98 = arith.constant 0 : index
    %189 = vector.load %arg14[%c0_97, %c0_98] : memref<8x128xf32, #tpu.memory_space<vmem>>, vector<8x128xf32>
    tpu.vector_store %arg14[%c0_97, %c0_98], %188 {strides = array<i32>} : memref<8x128xf32, #tpu.memory_space<vmem>>, vector<8x128xf32>,
    return
  }
  func.func @transform_0(%arg0: i32) -> (i32, i32) {
    %c0_i32 = arith.constant 0 : i32
    %c0_i32_0 = arith.constant 0 : i32
    return %c0_i32, %arg0 : i32, i32
  }
  func.func @transform_1(%arg0: i32) -> (i32, i32) {
    %c0_i32 = arith.constant 0 : i32
    %c0_i32_0 = arith.constant 0 : i32
    %c0_i32_1 = arith.constant 0 : i32
    return %c0_i32, %c0_i32_0 : i32, i32
  }
  func.func @transform_2(%arg0: i32) -> (i32, i32) {
    %c0_i32 = arith.constant 0 : i32
    %c0_i32_0 = arith.constant 0 : i32
    %c0_i32_1 = arith.constant 0 : i32
    return %c0_i32, %c0_i32_0 : i32, i32
  }
  func.func @transform_3(%arg0: i32) -> (i32, i32, i32) {
    %c0_i32 = arith.constant 0 : i32
    %c0_i32_0 = arith.constant 0 : i32
    %c0_i32_1 = arith.constant 0 : i32
    %c0_i32_2 = arith.constant 0 : i32
    return %c0_i32, %c0_i32_0, %c0_i32_1 : i32, i32, i32
  }
  func.func @transform_4(%arg0: i32) -> (i32, i32, i32) {
    %c0_i32 = arith.constant 0 : i32
    %c0_i32_0 = arith.constant 0 : i32
    %c0_i32_1 = arith.constant 0 : i32
    %c0_i32_2 = arith.constant 0 : i32
    return %c0_i32, %c0_i32_0, %c0_i32_1 : i32, i32, i32
  }
  func.func @transform_5(%arg0: i32) -> (i32, i32, i32) {
    %c0_i32 = arith.constant 0 : i32
    %c0_i32_0 = arith.constant 0 : i32
    %c0_i32_1 = arith.constant 0 : i32
    %c0_i32_2 = arith.constant 0 : i32
    return %c0_i32, %c0_i32_0, %c0_i32_1 : i32, i32, i32
  }
  func.func @transform_6(%arg0: i32) -> (i32, i32, i32) {
    %c0_i32 = arith.constant 0 : i32
    %c0_i32_0 = arith.constant 0 : i32
    %c0_i32_1 = arith.constant 0 : i32
    %c0_i32_2 = arith.constant 0 : i32
    return %c0_i32, %c0_i32_0, %c0_i32_1 : i32, i32, i32
  }
  func.func @transform_7(%arg0: i32) -> (i32, i32, i32) {
    %c0_i32 = arith.constant 0 : i32
    %c0_i32_0 = arith.constant 0 : i32
    %c0_i32_1 = arith.constant 0 : i32
    %c0_i32_2 = arith.constant 0 : i32
    return %c0_i32, %c0_i32_0, %c0_i32_1 : i32, i32, i32
  }
  func.func @transform_8(%arg0: i32) -> (i32, i32, i32) {
    %c0_i32 = arith.constant 0 : i32
    %c0_i32_0 = arith.constant 0 : i32
    %c0_i32_1 = arith.constant 0 : i32
    %c0_i32_2 = arith.constant 0 : i32
    return %c0_i32, %c0_i32_0, %c0_i32_1 : i32, i32, i32
  }
  func.func @transform_9(%arg0: i32) -> (i32, i32, i32) {
    %c0_i32 = arith.constant 0 : i32
    %c0_i32_0 = arith.constant 0 : i32
    %c0_i32_1 = arith.constant 0 : i32
    %c0_i32_2 = arith.constant 0 : i32
    return %c0_i32, %c0_i32_0, %c0_i32_1 : i32, i32, i32
  }
  func.func @transform_10(%arg0: i32) -> (i32, i32, i32) {
    %c0_i32 = arith.constant 0 : i32
    %c0_i32_0 = arith.constant 0 : i32
    %c0_i32_1 = arith.constant 0 : i32
    %c0_i32_2 = arith.constant 0 : i32
    return %c0_i32, %c0_i32_0, %c0_i32_1 : i32, i32, i32
  }
  func.func @transform_11(%arg0: i32) -> (i32, i32, i32) {
    %c0_i32 = arith.constant 0 : i32
    %c0_i32_0 = arith.constant 0 : i32
    %c0_i32_1 = arith.constant 0 : i32
    %c0_i32_2 = arith.constant 0 : i32
    return %c0_i32, %c0_i32_0, %c0_i32_1 : i32, i32, i32
  }
  func.func @transform_12(%arg0: i32) -> (i32, i32, i32) {
    %c0_i32 = arith.constant 0 : i32
    %c0_i32_0 = arith.constant 0 : i32
    %c0_i32_1 = arith.constant 0 : i32
    %c0_i32_2 = arith.constant 0 : i32
    return %c0_i32, %c0_i32_0, %c0_i32_1 : i32, i32, i32
  }
  func.func @transform_13(%arg0: i32) -> (i32, i32) {
    %c0_i32 = arith.constant 0 : i32
    %c0_i32_0 = arith.constant 0 : i32
    return %c0_i32, %arg0 : i32, i32
  }
}

module attributes {stable_mosaic.version = 11 : i64} {
  func.func @_encoder_kernel(%arg0: i32, %arg1: memref<8x128xf32, #tpu.memory_space<vmem>>, %arg2: memref<32x8xf32, #tpu.memory_space<vmem>>, %arg3: memref<8x32xf32, #tpu.memory_space<vmem>>, %arg4: memref<2x16x128xbf16, #tpu.memory_space<vmem>>, %arg5: memref<2x16x128xbf16, #tpu.memory_space<vmem>>, %arg6: memref<2x1x128xf32, #tpu.memory_space<vmem>>, %arg7: memref<2x1x128xf32, #tpu.memory_space<vmem>>, %arg8: memref<2x128x128xbf16, #tpu.memory_space<vmem>>, %arg9: memref<2x1x128xf32, #tpu.memory_space<vmem>>, %arg10: memref<2x128x128xbf16, #tpu.memory_space<vmem>>, %arg11: memref<2x1x128xf32, #tpu.memory_space<vmem>>, %arg12: memref<2x1x128xf32, #tpu.memory_space<vmem>>, %arg13: memref<2x1x128xf32, #tpu.memory_space<vmem>>, %arg14: memref<8x128xf32, #tpu.memory_space<vmem>>) attributes {dimension_semantics = [#tpu.dimension_semantics<parallel>], iteration_bounds = array<i64: 2>, scalar_prefetch = 0 : i64, scratch_operands = 0 : i64, tpu.core_type = #tpu.core_type<tc>, window_params = [{transform_indices = @transform_0, window_bounds = array<i64: 8, 128>}, {pipeline_mode = #tpu.pipeline_mode<synchronous>, transform_indices = @transform_1, window_bounds = array<i64: 32, 8>}, {pipeline_mode = #tpu.pipeline_mode<synchronous>, transform_indices = @transform_2, window_bounds = array<i64: 8, 32>}, {pipeline_mode = #tpu.pipeline_mode<synchronous>, transform_indices = @transform_3, window_bounds = array<i64: 2, 16, 128>}, {pipeline_mode = #tpu.pipeline_mode<synchronous>, transform_indices = @transform_4, window_bounds = array<i64: 2, 16, 128>}, {pipeline_mode = #tpu.pipeline_mode<synchronous>, transform_indices = @transform_5, window_bounds = array<i64: 2, 1, 128>}, {pipeline_mode = #tpu.pipeline_mode<synchronous>, transform_indices = @transform_6, window_bounds = array<i64: 2, 1, 128>}, {pipeline_mode = #tpu.pipeline_mode<synchronous>, transform_indices = @transform_7, window_bounds = array<i64: 2, 128, 128>}, {pipeline_mode = #tpu.pipeline_mode<synchronous>, transform_indices = @transform_8, window_bounds = array<i64: 2, 1, 128>}, {pipeline_mode = #tpu.pipeline_mode<synchronous>, transform_indices = @transform_9, window_bounds = array<i64: 2, 128, 128>}, {pipeline_mode = #tpu.pipeline_mode<synchronous>, transform_indices = @transform_10, window_bounds = array<i64: 2, 1, 128>}, {pipeline_mode = #tpu.pipeline_mode<synchronous>, transform_indices = @transform_11, window_bounds = array<i64: 2, 1, 128>}, {pipeline_mode = #tpu.pipeline_mode<synchronous>, transform_indices = @transform_12, window_bounds = array<i64: 2, 1, 128>}, {transform_indices = @transform_13, window_bounds = array<i64: 8, 128>}]} {
    %c0 = arith.constant 0 : index
    %c0_0 = arith.constant 0 : index
    %0 = vector.load %arg2[%c0, %c0_0] : memref<32x8xf32, #tpu.memory_space<vmem>>, vector<32x8xf32>
    %c0_1 = arith.constant 0 : index
    %c0_2 = arith.constant 0 : index
    %1 = vector.load %arg3[%c0_1, %c0_2] : memref<8x32xf32, #tpu.memory_space<vmem>>, vector<8x32xf32>
    %c0_3 = arith.constant 0 : index
    %c0_4 = arith.constant 0 : index
    %2 = vector.load %arg1[%c0_3, %c0_4] : memref<8x128xf32, #tpu.memory_space<vmem>>, vector<8x128xf32>
    %cst = arith.constant dense<0.000000e+00> : vector<32x128xf32>
    %3 = tpu.matmul %0, %2, %cst {dimension_numbers = #tpu.dot_dimension_numbers<[1], [0], [0], [1], [0, 0, 1, 1], [], []>} : vector<32x8xf32>, vector<8x128xf32>, vector<32x128xf32> -> vector<32x128xf32>
    %4 = vector.extract_strided_slice %3 {offsets = [0, 0], sizes = [16, 128], strides = [1, 1]} : vector<32x128xf32> to vector<16x128xf32>
    %5 = vector.extract_strided_slice %3 {offsets = [16, 0], sizes = [16, 128], strides = [1, 1]} : vector<32x128xf32> to vector<16x128xf32>
    %c0_5 = arith.constant 0 : index
    %c0_6 = arith.constant 0 : index
    %c0_7 = arith.constant 0 : index
    %6 = vector.load %arg4[%c0_5, %c0_6, %c0_7] : memref<2x16x128xbf16, #tpu.memory_space<vmem>>, vector<1x16x128xbf16>
    %7 = vector.shape_cast %6 : vector<1x16x128xbf16> to vector<16x128xbf16>
    %8 = arith.extf %7 : vector<16x128xbf16> to vector<16x128xf32>
    %c0_8 = arith.constant 0 : index
    %c0_9 = arith.constant 0 : index
    %c0_10 = arith.constant 0 : index
    %9 = vector.load %arg5[%c0_8, %c0_9, %c0_10] : memref<2x16x128xbf16, #tpu.memory_space<vmem>>, vector<1x16x128xbf16>
    %10 = vector.shape_cast %9 : vector<1x16x128xbf16> to vector<16x128xbf16>
    %11 = arith.extf %10 : vector<16x128xbf16> to vector<16x128xf32>
    %12 = arith.mulf %4, %8 : vector<16x128xf32>
    %13 = arith.mulf %5, %11 : vector<16x128xf32>
    %14 = arith.subf %12, %13 : vector<16x128xf32>
    %15 = arith.mulf %4, %11 : vector<16x128xf32>
    %16 = arith.mulf %5, %8 : vector<16x128xf32>
    %17 = arith.addf %15, %16 : vector<16x128xf32>
    %18 = tpu.concatenate %14, %17 in 0 : vector<16x128xf32>, vector<16x128xf32> -> vector<32x128xf32>
    %cst_11 = arith.constant dense<0.000000e+00> : vector<8x128xf32>
    %19 = tpu.matmul %1, %18, %cst_11 {dimension_numbers = #tpu.dot_dimension_numbers<[1], [0], [0], [1], [0, 0, 1, 1], [], []>} : vector<8x32xf32>, vector<32x128xf32>, vector<8x128xf32> -> vector<8x128xf32>
    %20 = arith.addf %19, %2 : vector<8x128xf32>
    %c0_12 = arith.constant 0 : index
    %c0_13 = arith.constant 0 : index
    %c0_14 = arith.constant 0 : index
    %21 = vector.load %arg6[%c0_12, %c0_13, %c0_14] : memref<2x1x128xf32, #tpu.memory_space<vmem>>, vector<1x1x128xf32>
    %22 = vector.shape_cast %21 : vector<1x1x128xf32> to vector<1x128xf32>
    %c0_15 = arith.constant 0 : index
    %c0_16 = arith.constant 0 : index
    %c0_17 = arith.constant 0 : index
    %23 = vector.load %arg7[%c0_15, %c0_16, %c0_17] : memref<2x1x128xf32, #tpu.memory_space<vmem>>, vector<1x1x128xf32>
    %24 = vector.shape_cast %23 : vector<1x1x128xf32> to vector<1x128xf32>
    %cst_18 = arith.constant dense<0.000000e+00> : vector<8xf32>
    %25 = vector.multi_reduction <add>, %20, %cst_18 [1] : vector<8x128xf32> to vector<8xf32>
    %26 = vector.shape_cast %25 : vector<8xf32> to vector<8x1xf32>
    %cst_19 = arith.constant 3.125000e-02 : f32
    %27 = vector.broadcast %cst_19 : f32 to vector<8x1xf32>
    %28 = arith.mulf %26, %27 : vector<8x1xf32>
    %29 = vector.broadcast %28 : vector<8x1xf32> to vector<8x128xf32>
    %30 = arith.subf %20, %29 : vector<8x128xf32>
    %31 = arith.mulf %30, %30 : vector<8x128xf32>
    %cst_20 = arith.constant dense<0.000000e+00> : vector<8xf32>
    %32 = vector.multi_reduction <add>, %31, %cst_20 [1] : vector<8x128xf32> to vector<8xf32>
    %33 = vector.shape_cast %32 : vector<8xf32> to vector<8x1xf32>
    %34 = arith.mulf %28, %28 : vector<8x1xf32>
    %cst_21 = arith.constant 9.600000e+01 : f32
    %35 = vector.broadcast %cst_21 : f32 to vector<8x1xf32>
    %36 = arith.mulf %35, %34 : vector<8x1xf32>
    %37 = arith.subf %33, %36 : vector<8x1xf32>
    %cst_22 = arith.constant 3.125000e-02 : f32
    %38 = vector.broadcast %cst_22 : f32 to vector<8x1xf32>
    %39 = arith.mulf %37, %38 : vector<8x1xf32>
    %cst_23 = arith.constant 9.99999996E-13 : f32
    %40 = vector.broadcast %cst_23 : f32 to vector<8x1xf32>
    %41 = arith.addf %39, %40 : vector<8x1xf32>
    %42 = math.rsqrt %41 : vector<8x1xf32>
    %43 = vector.broadcast %42 : vector<8x1xf32> to vector<8x128xf32>
    %44 = arith.mulf %30, %43 : vector<8x128xf32>
    %45 = vector.broadcast %22 : vector<1x128xf32> to vector<8x128xf32>
    %46 = arith.mulf %45, %44 : vector<8x128xf32>
    %47 = vector.broadcast %24 : vector<1x128xf32> to vector<8x128xf32>
    %48 = arith.addf %46, %47 : vector<8x128xf32>
    %c0_24 = arith.constant 0 : index
    %c0_25 = arith.constant 0 : index
    %c0_26 = arith.constant 0 : index
    %49 = vector.load %arg12[%c0_24, %c0_25, %c0_26] : memref<2x1x128xf32, #tpu.memory_space<vmem>>, vector<1x1x128xf32>
    %50 = vector.shape_cast %49 : vector<1x1x128xf32> to vector<1x128xf32>
    %c0_27 = arith.constant 0 : index
    %c0_28 = arith.constant 0 : index
    %c0_29 = arith.constant 0 : index
    %51 = vector.load %arg13[%c0_27, %c0_28, %c0_29] : memref<2x1x128xf32, #tpu.memory_space<vmem>>, vector<1x1x128xf32>
    %52 = vector.shape_cast %51 : vector<1x1x128xf32> to vector<1x128xf32>
    %cst_30 = arith.constant dense<0.000000e+00> : vector<8xf32>
    %53 = vector.multi_reduction <add>, %48, %cst_30 [1] : vector<8x128xf32> to vector<8xf32>
    %54 = vector.shape_cast %53 : vector<8xf32> to vector<8x1xf32>
    %cst_31 = arith.constant 3.125000e-02 : f32
    %55 = vector.broadcast %cst_31 : f32 to vector<8x1xf32>
    %56 = arith.mulf %54, %55 : vector<8x1xf32>
    %57 = vector.broadcast %56 : vector<8x1xf32> to vector<8x128xf32>
    %58 = arith.subf %48, %57 : vector<8x128xf32>
    %59 = arith.mulf %58, %58 : vector<8x128xf32>
    %cst_32 = arith.constant dense<0.000000e+00> : vector<8xf32>
    %60 = vector.multi_reduction <add>, %59, %cst_32 [1] : vector<8x128xf32> to vector<8xf32>
    %61 = vector.shape_cast %60 : vector<8xf32> to vector<8x1xf32>
    %62 = arith.mulf %56, %56 : vector<8x1xf32>
    %cst_33 = arith.constant 9.600000e+01 : f32
    %63 = vector.broadcast %cst_33 : f32 to vector<8x1xf32>
    %64 = arith.mulf %63, %62 : vector<8x1xf32>
    %65 = arith.subf %61, %64 : vector<8x1xf32>
    %cst_34 = arith.constant 3.125000e-02 : f32
    %66 = vector.broadcast %cst_34 : f32 to vector<8x1xf32>
    %67 = arith.mulf %65, %66 : vector<8x1xf32>
    %cst_35 = arith.constant 9.99999996E-13 : f32
    %68 = vector.broadcast %cst_35 : f32 to vector<8x1xf32>
    %69 = arith.addf %67, %68 : vector<8x1xf32>
    %70 = math.rsqrt %69 : vector<8x1xf32>
    %71 = vector.broadcast %70 : vector<8x1xf32> to vector<8x128xf32>
    %72 = arith.mulf %58, %71 : vector<8x128xf32>
    %73 = vector.broadcast %50 : vector<1x128xf32> to vector<8x128xf32>
    %74 = arith.mulf %73, %72 : vector<8x128xf32>
    %75 = vector.broadcast %52 : vector<1x128xf32> to vector<8x128xf32>
    %76 = arith.addf %74, %75 : vector<8x128xf32>
    %c0_36 = arith.constant 0 : index
    %c0_37 = arith.constant 0 : index
    %c0_38 = arith.constant 0 : index
    %77 = vector.load %arg8[%c0_36, %c0_37, %c0_38] : memref<2x128x128xbf16, #tpu.memory_space<vmem>>, vector<1x128x128xbf16>
    %78 = vector.shape_cast %77 : vector<1x128x128xbf16> to vector<128x128xbf16>
    %79 = arith.truncf %76 : vector<8x128xf32> to vector<8x128xbf16>
    %cst_39 = arith.constant dense<0.000000e+00> : vector<8x128xf32>
    %80 = tpu.matmul %79, %78, %cst_39 {dimension_numbers = #tpu.dot_dimension_numbers<[1], [0], [0], [1], [0, 0, 1, 1], [], []>} : vector<8x128xbf16>, vector<128x128xbf16>, vector<8x128xf32> -> vector<8x128xf32>
    %c0_40 = arith.constant 0 : index
    %c0_41 = arith.constant 0 : index
    %c0_42 = arith.constant 0 : index
    %81 = vector.load %arg9[%c0_40, %c0_41, %c0_42] : memref<2x1x128xf32, #tpu.memory_space<vmem>>, vector<1x1x128xf32>
    %82 = vector.shape_cast %81 : vector<1x1x128xf32> to vector<1x128xf32>
    %83 = vector.broadcast %82 : vector<1x128xf32> to vector<8x128xf32>
    %84 = arith.addf %80, %83 : vector<8x128xf32>
    %cst_43 = arith.constant 0.000000e+00 : f32
    %85 = vector.broadcast %cst_43 : f32 to vector<8x128xf32>
    %86 = arith.maximumf %84, %85 : vector<8x128xf32>
    %c0_44 = arith.constant 0 : index
    %c0_45 = arith.constant 0 : index
    %c0_46 = arith.constant 0 : index
    %87 = vector.load %arg10[%c0_44, %c0_45, %c0_46] : memref<2x128x128xbf16, #tpu.memory_space<vmem>>, vector<1x128x128xbf16>
    %88 = vector.shape_cast %87 : vector<1x128x128xbf16> to vector<128x128xbf16>
    %89 = arith.truncf %86 : vector<8x128xf32> to vector<8x128xbf16>
    %cst_47 = arith.constant dense<0.000000e+00> : vector<8x128xf32>
    %90 = tpu.matmul %89, %88, %cst_47 {dimension_numbers = #tpu.dot_dimension_numbers<[1], [0], [0], [1], [0, 0, 1, 1], [], []>} : vector<8x128xbf16>, vector<128x128xbf16>, vector<8x128xf32> -> vector<8x128xf32>
    %c0_48 = arith.constant 0 : index
    %c0_49 = arith.constant 0 : index
    %c0_50 = arith.constant 0 : index
    %91 = vector.load %arg11[%c0_48, %c0_49, %c0_50] : memref<2x1x128xf32, #tpu.memory_space<vmem>>, vector<1x1x128xf32>
    %92 = vector.shape_cast %91 : vector<1x1x128xf32> to vector<1x128xf32>
    %93 = vector.broadcast %92 : vector<1x128xf32> to vector<8x128xf32>
    %94 = arith.addf %90, %93 : vector<8x128xf32>
    %95 = arith.addf %94, %48 : vector<8x128xf32>
    %cst_51 = arith.constant dense<0.000000e+00> : vector<32x128xf32>
    %96 = tpu.matmul %0, %95, %cst_51 {dimension_numbers = #tpu.dot_dimension_numbers<[1], [0], [0], [1], [0, 0, 1, 1], [], []>} : vector<32x8xf32>, vector<8x128xf32>, vector<32x128xf32> -> vector<32x128xf32>
    %97 = vector.extract_strided_slice %96 {offsets = [0, 0], sizes = [16, 128], strides = [1, 1]} : vector<32x128xf32> to vector<16x128xf32>
    %98 = vector.extract_strided_slice %96 {offsets = [16, 0], sizes = [16, 128], strides = [1, 1]} : vector<32x128xf32> to vector<16x128xf32>
    %c1 = arith.constant 1 : index
    %c0_52 = arith.constant 0 : index
    %c0_53 = arith.constant 0 : index
    %99 = vector.load %arg4[%c1, %c0_52, %c0_53] : memref<2x16x128xbf16, #tpu.memory_space<vmem>>, vector<1x16x128xbf16>
    %100 = vector.shape_cast %99 : vector<1x16x128xbf16> to vector<16x128xbf16>
    %101 = arith.extf %100 : vector<16x128xbf16> to vector<16x128xf32>
    %c1_54 = arith.constant 1 : index
    %c0_55 = arith.constant 0 : index
    %c0_56 = arith.constant 0 : index
    %102 = vector.load %arg5[%c1_54, %c0_55, %c0_56] : memref<2x16x128xbf16, #tpu.memory_space<vmem>>, vector<1x16x128xbf16>
    %103 = vector.shape_cast %102 : vector<1x16x128xbf16> to vector<16x128xbf16>
    %104 = arith.extf %103 : vector<16x128xbf16> to vector<16x128xf32>
    %105 = arith.mulf %97, %101 : vector<16x128xf32>
    %106 = arith.mulf %98, %104 : vector<16x128xf32>
    %107 = arith.subf %105, %106 : vector<16x128xf32>
    %108 = arith.mulf %97, %104 : vector<16x128xf32>
    %109 = arith.mulf %98, %101 : vector<16x128xf32>
    %110 = arith.addf %108, %109 : vector<16x128xf32>
    %111 = tpu.concatenate %107, %110 in 0 : vector<16x128xf32>, vector<16x128xf32> -> vector<32x128xf32>
    %cst_57 = arith.constant dense<0.000000e+00> : vector<8x128xf32>
    %112 = tpu.matmul %1, %111, %cst_57 {dimension_numbers = #tpu.dot_dimension_numbers<[1], [0], [0], [1], [0, 0, 1, 1], [], []>} : vector<8x32xf32>, vector<32x128xf32>, vector<8x128xf32> -> vector<8x128xf32>
    %113 = arith.addf %112, %95 : vector<8x128xf32>
    %c1_58 = arith.constant 1 : index
    %c0_59 = arith.constant 0 : index
    %c0_60 = arith.constant 0 : index
    %114 = vector.load %arg6[%c1_58, %c0_59, %c0_60] : memref<2x1x128xf32, #tpu.memory_space<vmem>>, vector<1x1x128xf32>
    %115 = vector.shape_cast %114 : vector<1x1x128xf32> to vector<1x128xf32>
    %c1_61 = arith.constant 1 : index
    %c0_62 = arith.constant 0 : index
    %c0_63 = arith.constant 0 : index
    %116 = vector.load %arg7[%c1_61, %c0_62, %c0_63] : memref<2x1x128xf32, #tpu.memory_space<vmem>>, vector<1x1x128xf32>
    %117 = vector.shape_cast %116 : vector<1x1x128xf32> to vector<1x128xf32>
    %cst_64 = arith.constant dense<0.000000e+00> : vector<8xf32>
    %118 = vector.multi_reduction <add>, %113, %cst_64 [1] : vector<8x128xf32> to vector<8xf32>
    %119 = vector.shape_cast %118 : vector<8xf32> to vector<8x1xf32>
    %cst_65 = arith.constant 3.125000e-02 : f32
    %120 = vector.broadcast %cst_65 : f32 to vector<8x1xf32>
    %121 = arith.mulf %119, %120 : vector<8x1xf32>
    %122 = vector.broadcast %121 : vector<8x1xf32> to vector<8x128xf32>
    %123 = arith.subf %113, %122 : vector<8x128xf32>
    %124 = arith.mulf %123, %123 : vector<8x128xf32>
    %cst_66 = arith.constant dense<0.000000e+00> : vector<8xf32>
    %125 = vector.multi_reduction <add>, %124, %cst_66 [1] : vector<8x128xf32> to vector<8xf32>
    %126 = vector.shape_cast %125 : vector<8xf32> to vector<8x1xf32>
    %127 = arith.mulf %121, %121 : vector<8x1xf32>
    %cst_67 = arith.constant 9.600000e+01 : f32
    %128 = vector.broadcast %cst_67 : f32 to vector<8x1xf32>
    %129 = arith.mulf %128, %127 : vector<8x1xf32>
    %130 = arith.subf %126, %129 : vector<8x1xf32>
    %cst_68 = arith.constant 3.125000e-02 : f32
    %131 = vector.broadcast %cst_68 : f32 to vector<8x1xf32>
    %132 = arith.mulf %130, %131 : vector<8x1xf32>
    %cst_69 = arith.constant 9.99999996E-13 : f32
    %133 = vector.broadcast %cst_69 : f32 to vector<8x1xf32>
    %134 = arith.addf %132, %133 : vector<8x1xf32>
    %135 = math.rsqrt %134 : vector<8x1xf32>
    %136 = vector.broadcast %135 : vector<8x1xf32> to vector<8x128xf32>
    %137 = arith.mulf %123, %136 : vector<8x128xf32>
    %138 = vector.broadcast %115 : vector<1x128xf32> to vector<8x128xf32>
    %139 = arith.mulf %138, %137 : vector<8x128xf32>
    %140 = vector.broadcast %117 : vector<1x128xf32> to vector<8x128xf32>
    %141 = arith.addf %139, %140 : vector<8x128xf32>
    %c1_70 = arith.constant 1 : index
    %c0_71 = arith.constant 0 : index
    %c0_72 = arith.constant 0 : index
    %142 = vector.load %arg12[%c1_70, %c0_71, %c0_72] : memref<2x1x128xf32, #tpu.memory_space<vmem>>, vector<1x1x128xf32>
    %143 = vector.shape_cast %142 : vector<1x1x128xf32> to vector<1x128xf32>
    %c1_73 = arith.constant 1 : index
    %c0_74 = arith.constant 0 : index
    %c0_75 = arith.constant 0 : index
    %144 = vector.load %arg13[%c1_73, %c0_74, %c0_75] : memref<2x1x128xf32, #tpu.memory_space<vmem>>, vector<1x1x128xf32>
    %145 = vector.shape_cast %144 : vector<1x1x128xf32> to vector<1x128xf32>
    %cst_76 = arith.constant dense<0.000000e+00> : vector<8xf32>
    %146 = vector.multi_reduction <add>, %141, %cst_76 [1] : vector<8x128xf32> to vector<8xf32>
    %147 = vector.shape_cast %146 : vector<8xf32> to vector<8x1xf32>
    %cst_77 = arith.constant 3.125000e-02 : f32
    %148 = vector.broadcast %cst_77 : f32 to vector<8x1xf32>
    %149 = arith.mulf %147, %148 : vector<8x1xf32>
    %150 = vector.broadcast %149 : vector<8x1xf32> to vector<8x128xf32>
    %151 = arith.subf %141, %150 : vector<8x128xf32>
    %152 = arith.mulf %151, %151 : vector<8x128xf32>
    %cst_78 = arith.constant dense<0.000000e+00> : vector<8xf32>
    %153 = vector.multi_reduction <add>, %152, %cst_78 [1] : vector<8x128xf32> to vector<8xf32>
    %154 = vector.shape_cast %153 : vector<8xf32> to vector<8x1xf32>
    %155 = arith.mulf %149, %149 : vector<8x1xf32>
    %cst_79 = arith.constant 9.600000e+01 : f32
    %156 = vector.broadcast %cst_79 : f32 to vector<8x1xf32>
    %157 = arith.mulf %156, %155 : vector<8x1xf32>
    %158 = arith.subf %154, %157 : vector<8x1xf32>
    %cst_80 = arith.constant 3.125000e-02 : f32
    %159 = vector.broadcast %cst_80 : f32 to vector<8x1xf32>
    %160 = arith.mulf %158, %159 : vector<8x1xf32>
    %cst_81 = arith.constant 9.99999996E-13 : f32
    %161 = vector.broadcast %cst_81 : f32 to vector<8x1xf32>
    %162 = arith.addf %160, %161 : vector<8x1xf32>
    %163 = math.rsqrt %162 : vector<8x1xf32>
    %164 = vector.broadcast %163 : vector<8x1xf32> to vector<8x128xf32>
    %165 = arith.mulf %151, %164 : vector<8x128xf32>
    %166 = vector.broadcast %143 : vector<1x128xf32> to vector<8x128xf32>
    %167 = arith.mulf %166, %165 : vector<8x128xf32>
    %168 = vector.broadcast %145 : vector<1x128xf32> to vector<8x128xf32>
    %169 = arith.addf %167, %168 : vector<8x128xf32>
    %c1_82 = arith.constant 1 : index
    %c0_83 = arith.constant 0 : index
    %c0_84 = arith.constant 0 : index
    %170 = vector.load %arg8[%c1_82, %c0_83, %c0_84] : memref<2x128x128xbf16, #tpu.memory_space<vmem>>, vector<1x128x128xbf16>
    %171 = vector.shape_cast %170 : vector<1x128x128xbf16> to vector<128x128xbf16>
    %172 = arith.truncf %169 : vector<8x128xf32> to vector<8x128xbf16>
    %cst_85 = arith.constant dense<0.000000e+00> : vector<8x128xf32>
    %173 = tpu.matmul %172, %171, %cst_85 {dimension_numbers = #tpu.dot_dimension_numbers<[1], [0], [0], [1], [0, 0, 1, 1], [], []>} : vector<8x128xbf16>, vector<128x128xbf16>, vector<8x128xf32> -> vector<8x128xf32>
    %c1_86 = arith.constant 1 : index
    %c0_87 = arith.constant 0 : index
    %c0_88 = arith.constant 0 : index
    %174 = vector.load %arg9[%c1_86, %c0_87, %c0_88] : memref<2x1x128xf32, #tpu.memory_space<vmem>>, vector<1x1x128xf32>
    %175 = vector.shape_cast %174 : vector<1x1x128xf32> to vector<1x128xf32>
    %176 = vector.broadcast %175 : vector<1x128xf32> to vector<8x128xf32>
    %177 = arith.addf %173, %176 : vector<8x128xf32>
    %cst_89 = arith.constant 0.000000e+00 : f32
    %178 = vector.broadcast %cst_89 : f32 to vector<8x128xf32>
    %179 = arith.maximumf %177, %178 : vector<8x128xf32>
    %c1_90 = arith.constant 1 : index
    %c0_91 = arith.constant 0 : index
    %c0_92 = arith.constant 0 : index
    %180 = vector.load %arg10[%c1_90, %c0_91, %c0_92] : memref<2x128x128xbf16, #tpu.memory_space<vmem>>, vector<1x128x128xbf16>
    %181 = vector.shape_cast %180 : vector<1x128x128xbf16> to vector<128x128xbf16>
    %182 = arith.truncf %179 : vector<8x128xf32> to vector<8x128xbf16>
    %cst_93 = arith.constant dense<0.000000e+00> : vector<8x128xf32>
    %183 = tpu.matmul %182, %181, %cst_93 {dimension_numbers = #tpu.dot_dimension_numbers<[1], [0], [0], [1], [0, 0, 1, 1], [], []>} : vector<8x128xbf16>, vector<128x128xbf16>, vector<8x128xf32> -> vector<8x128xf32>
    %c1_94 = arith.constant 1 : index
    %c0_95 = arith.constant 0 : index
    %c0_96 = arith.constant 0 : index
    %184 = vector.load %arg11[%c1_94, %c0_95, %c0_96] : memref<2x1x128xf32, #tpu.memory_space<vmem>>, vector<1x1x128xf32>
    %185 = vector.shape_cast %184 : vector<1x1x128xf32> to vector<1x128xf32>
    %186 = vector.broadcast %185 : vector<1x128xf32> to vector<8x128xf32>
    %187 = arith.addf %183, %186 : vector<8x128xf32>
    %188 = arith.addf %187, %141 : vector<8x128xf32>
    %c0_97 = arith.constant 0 : index
    %c0_98 = arith.constant 0 : index
    %189 = vector.load %arg14[%c0_97, %c0_98] : memref<8x128xf32, #tpu.memory_space<vmem>>, vector<8x128xf32>
    tpu.vector_store %arg14[%c0_97, %c0_98], %188 {strides = array<i32>} : memref<8x128xf32, #tpu.memory_space<vmem>>, vector<8x128xf32>,
    return
  }
  func.func @transform_0(%arg0: i32) -> (i32, i32) {
    %c0_i32 = arith.constant 0 : i32
    %c0_i32_0 = arith.constant 0 : i32
    return %c0_i32, %arg0 : i32, i32
  }
  func.func @transform_1(%arg0: i32) -> (i32, i32) {
    %c0_i32 = arith.constant 0 : i32
    %c0_i32_0 = arith.constant 0 : i32
    %c0_i32_1 = arith.constant 0 : i32
    return %c0_i32, %c0_i32_0 : i32, i32
  }
  func.func @transform_2(%arg0: i32) -> (i32, i32) {
    %c0_i32 = arith.constant 0 : i32
    %c0_i32_0 = arith.constant 0 : i32
    %c0_i32_1 = arith.constant 0 : i32
    return %c0_i32, %c0_i32_0 : i32, i32
  }
  func.func @transform_3(%arg0: i32) -> (i32, i32, i32) {
    %c0_i32 = arith.constant 0 : i32
    %c0_i32_0 = arith.constant 0 : i32
    %c0_i32_1 = arith.constant 0 : i32
    %c0_i32_2 = arith.constant 0 : i32
    return %c0_i32, %c0_i32_0, %c0_i32_1 : i32, i32, i32
  }
  func.func @transform_4(%arg0: i32) -> (i32, i32, i32) {
    %c0_i32 = arith.constant 0 : i32
    %c0_i32_0 = arith.constant 0 : i32
    %c0_i32_1 = arith.constant 0 : i32
    %c0_i32_2 = arith.constant 0 : i32
    return %c0_i32, %c0_i32_0, %c0_i32_1 : i32, i32, i32
  }
  func.func @transform_5(%arg0: i32) -> (i32, i32, i32) {
    %c0_i32 = arith.constant 0 : i32
    %c0_i32_0 = arith.constant 0 : i32
    %c0_i32_1 = arith.constant 0 : i32
    %c0_i32_2 = arith.constant 0 : i32
    return %c0_i32, %c0_i32_0, %c0_i32_1 : i32, i32, i32
  }
  func.func @transform_6(%arg0: i32) -> (i32, i32, i32) {
    %c0_i32 = arith.constant 0 : i32
    %c0_i32_0 = arith.constant 0 : i32
    %c0_i32_1 = arith.constant 0 : i32
    %c0_i32_2 = arith.constant 0 : i32
    return %c0_i32, %c0_i32_0, %c0_i32_1 : i32, i32, i32
  }
  func.func @transform_7(%arg0: i32) -> (i32, i32, i32) {
    %c0_i32 = arith.constant 0 : i32
    %c0_i32_0 = arith.constant 0 : i32
    %c0_i32_1 = arith.constant 0 : i32
    %c0_i32_2 = arith.constant 0 : i32
    return %c0_i32, %c0_i32_0, %c0_i32_1 : i32, i32, i32
  }
  func.func @transform_8(%arg0: i32) -> (i32, i32, i32) {
    %c0_i32 = arith.constant 0 : i32
    %c0_i32_0 = arith.constant 0 : i32
    %c0_i32_1 = arith.constant 0 : i32
    %c0_i32_2 = arith.constant 0 : i32
    return %c0_i32, %c0_i32_0, %c0_i32_1 : i32, i32, i32
  }
  func.func @transform_9(%arg0: i32) -> (i32, i32, i32) {
    %c0_i32 = arith.constant 0 : i32
    %c0_i32_0 = arith.constant 0 : i32
    %c0_i32_1 = arith.constant 0 : i32
    %c0_i32_2 = arith.constant 0 : i32
    return %c0_i32, %c0_i32_0, %c0_i32_1 : i32, i32, i32
  }
  func.func @transform_10(%arg0: i32) -> (i32, i32, i32) {
    %c0_i32 = arith.constant 0 : i32
    %c0_i32_0 = arith.constant 0 : i32
    %c0_i32_1 = arith.constant 0 : i32
    %c0_i32_2 = arith.constant 0 : i32
    return %c0_i32, %c0_i32_0, %c0_i32_1 : i32, i32, i32
  }
  func.func @transform_11(%arg0: i32) -> (i32, i32, i32) {
    %c0_i32 = arith.constant 0 : i32
    %c0_i32_0 = arith.constant 0 : i32
    %c0_i32_1 = arith.constant 0 : i32
    %c0_i32_2 = arith.constant 0 : i32
    return %c0_i32, %c0_i32_0, %c0_i32_1 : i32, i32, i32
  }
  func.func @transform_12(%arg0: i32) -> (i32, i32, i32) {
    %c0_i32 = arith.constant 0 : i32
    %c0_i32_0 = arith.constant 0 : i32
    %c0_i32_1 = arith.constant 0 : i32
    %c0_i32_2 = arith.constant 0 : i32
    return %c0_i32, %c0_i32_0, %c0_i32_1 : i32, i32, i32
  }
  func.func @transform_13(%arg0: i32) -> (i32, i32) {
    %c0_i32 = arith.constant 0 : i32
    %c0_i32_0 = arith.constant 0 : i32
    return %c0_i32, %arg0 : i32, i32
  }
}

</mosaic_0001>

<bundles_post_ra>
// kernel: encoder_forward.1
= control target key start
LH: loop header
LB: loop body
LE: loop exit
PB: predicated region body
PF: predicated region fallthrough
CT: control target
= control target key end

     0   :  { %18 = vsyncpa [#allocation3], 0  ;;  %s2330_s0 = inlined_call_operand.vmem [shape: f32[8,256], index: 0, kind: input, shape index: {}]   ;;  %s2331_s1 = inlined_call_operand.vmem [shape: f32[32,8], index: 1, kind: input, shape index: {}]   ;;  %s2332_s2 = inlined_call_operand.vmem [shape: f32[8,32], index: 2, kind: input, shape index: {}]   ;;  %s2333_s3 = inlined_call_operand.vmem [shape: bf16[2,16,128], index: 3, kind: input, shape index: {}]   ;;  %s2334_s4 = inlined_call_operand.vmem [shape: bf16[2,16,128], index: 4, kind: input, shape index: {}]   ;;  %s2335_s5 = inlined_call_operand.vmem [shape: f32[2,1,128], index: 5, kind: input, shape index: {}]   ;;  %s2336_s6 = inlined_call_operand.vmem [shape: f32[2,1,128], index: 6, kind: input, shape index: {}]   ;;  %s2337_s7 = inlined_call_operand.vmem [shape: bf16[2,128,128], index: 7, kind: input, shape index: {}]   ;;  %s2338_s8 = inlined_call_operand.vmem [shape: f32[2,1,128], index: 8, kind: input, shape index: {}]   ;;  %s2339_s9 = inlined_call_operand.vmem [shape: bf16[2,128,128], index: 9, kind: input, shape index: {}]   ;;  %s2340_s10 = inlined_call_operand.vmem [shape: f32[2,1,128], index: 10, kind: input, shape index: {}]   ;;  %s2341_s11 = inlined_call_operand.vmem [shape: f32[2,1,128], index: 11, kind: input, shape index: {}]   ;;  %s2342_s12 = inlined_call_operand.vmem [shape: f32[2,1,128], index: 12, kind: input, shape index: {}]   ;;  %s2343_s13 = inlined_call_operand.hbm [shape: f32[8,256], index: 13, kind: output, shape index: {}]  }
   0x1   :  { %20 = vsyncpa [#allocation3 + $0x1], 0  ;;  %s1980_s25 = smov 0   ;;  %s1982_s26 = smov 0  }
   0x2   :  { %s1984_s27 = smov 0   ;;  %s1986_s28 = smov 0  }
   0x3 LB: > { %2347 = sst [smem:[#allocation5_spill]] %s1901_s27  ;;  %s2001_s29 = sadd.s32 4294967295, %s1905_s28   ;;  %s1905_s28 = sphi %s1986_s28, %s2352_s28   ;;  %s1901_s27 = sphi %s1984_s27, %s2357_s27   ;;  %s1897_s26 = sphi %s1982_s26, %s2356_s26   ;;  %s1893_s25 = sphi %s1980_s25, %s2355_s25  }
   0x4   : > { %s1466_s30 = sadd.s32 4294967294, %s1905_s28   ;;  %s2005_s14 = sadd.s32 1, %s1905_s28  }
   0x5   : > { %2348 = sst [smem:[#allocation6_spill]] %s2005_s14  ;;  %s311_s15 = sadd.s32 1, %s1901_s27 }
   0x6   : > { %s308_s16 = ssub.s32 %s1905_s28, %s2005_s14  ;;  %p321_p0 = scmp.ne.s32.totalorder %s1901_s27, %s1897_s26 }
   0x7   : > { %p309_p1 = scmp.eq.s32.totalorder %s308_s16, 0  ;;  %p322_p2 = scmp.eq.s32.totalorder %s2001_s29, 1 }
   0x8   : > { %p327_p3 = scmp.ne.s32.totalorder %s1897_s26, %s1893_s25  ;;  %p328_p4 = scmp.eq.s32.totalorder %s1466_s30, 1 }
   0x9   : > { %s2016_s17 = scalar_select %p309_p1, %s1901_s27, %s311_s15  }
   0xa   : > { %p2018_p5 = por %p322_p2, %p321_p0  ;;  %p2022_p6 = por %p328_p4, %p327_p3 }
   0xb   : > { %2349 = sst [smem:[#allocation7_spill]] %s2016_s17  ;;  %p1469_p7 = scmp.ge.s32.totalorder %s1905_s28, 1 }
   0xc   : > { %p389_p8 = scmp.lt.s32.totalorder %s1905_s28, 3 }
   0xe   : > { %p390_p9 = pnand %p1469_p7, %p389_p8 }
   0xf   : > { %p432_p10 = scmp.lt.s32.totalorder (!%p390_p9), %s2001_s29, 1  ;;  %s429_s16 = sand.u32 (!%p390_p9), 1, %s1897_s26  }
  0x10   : > { %393 = sbr.rel (%p390_p9) target bundleno = 2878 (0xb3e), region = 72  ;;  %s1470_s20 = sshll.u32 (!%p390_p9), %s429_s16, 3 }
  0x11   : > { %s1569_s14 = sshll.u32 (!%p390_p9), %s2001_s29, 7 }
  0x12   : > { %s2289_s30 = scalar_lea.hbm (!%p390_p9), %s2343_s13, %s1569_s14 }
  0x15   : > { %v2032_v0 = vld [vmem:[%s2331_s1] sm:$0xff]  ;;  %vm443_vm0 = vcmask 64512   ;;  %s433_s22 = scalar_select %p432_p10, %s2001_s29, 1  ;;  %v2040_v1 = vld [vmem:[%s2331_s1 + $0x8] sm:$0xff]  ;;  %v2048_v2 = vld [vmem:[%s2331_s1 + $0x10] sm:$0xff]  ;;  %v1907_v5 = vmov 0.0  }
  0x16   : > { %1648 = vmatprep.mubr.msk.f32.mxu0 %vm443_vm0, %v2032_v0  ;;  %v2053_v4 = vld [vmem:[%s2331_s1 + $0x18] sm:$0xff]  ;;  %1654 = vmatprep.subr.mxu1 %v1907_v5  ;;  %vm1908_vm1 = vmmov 0   ;;  %v1577_v6 = vld [vmem:[%s2334_s4] sm:$0xff]   ;;  %vm561_vm2 = vcmask 261120   ;;  %v1806_v53 = vld [vmem:[%s2337_s7 + $0x30] sm:$0xff]   ;;  %s1394_s29 = scalar_lea.sflag [#allocation3], %s429_s16 }
  0x17   : > { %s1471_s23 = sshll.u32 %s433_s22, 3  ;;  %1662 = vmatprep.mubr.msk.f32.mxu1 %vm1908_vm1, %v1907_v5  ;;  %v1573_v8 = vld [vmem:[%s2333_s3] sm:$0xff]   ;;  %v1579_v9 = vunpack.c.h.bf16 %v1577_v6  ;;  %v1578_v12 = vunpack.c.l.bf16 %v1577_v6  ;;  %v1805_v48 = vld [vmem:[%s2337_s7 + $0x38] sm:$0xff]   ;;  %v1807_v54 = vld [vmem:[%s2337_s7 + $0x28] sm:$0xff]  }
  0x18   : > { %s435_s17 = scalar_lea.vmem %s2330_s0, %s1471_s23  ;;  %v1575_v11 = vunpack.c.h.bf16 %v1573_v8  ;;  %v1574_v15 = vunpack.c.l.bf16 %v1573_v8  ;;  %v2078_v28 = vld [vmem:[%s2332_s2] sm:$0xff]  ;;  %v1809_v56 = vld [vmem:[%s2337_s7 + $0x18] sm:$0xff]   ;;  %v1810_v57 = vld [vmem:[%s2337_s7 + $0x10] sm:$0xff]  }
  0x19   : > { %v442_v3 = vld [vmem:[%s435_s17] sm:$0xff]  ;;  %v1811_v58 = vld [vmem:[%s2337_s7 + $0x8] sm:$0xff]   ;;  %v1813_v60 = vld [vmem:[%s2339_s9 + $0x38] sm:$0xff]   ;;  %s431_s17 = scalar_lea.vmem [#allocation2], %s1470_s20  ;;  %s1909_s20 = smov [#allocation2]  }
  0x1a   : > { %1646 = vmatprep.subr.mxu0 %v442_v3  ;;  %v1477_v43 = vld [vmem:[%s2335_s5] ss:$0 sm:$0xff]  ;;  %v1814_v61 = vld [vmem:[%s2339_s9 + $0x30] sm:$0xff]   ;;  %v1815_v62 = vld [vmem:[%s2339_s9 + $0x28] sm:$0xff]   ;;  %s1407_s22 = sshll.u32 %s431_s17, 4  ;;  %s1849_s21 = sshll.u32 %s1909_s20, 4  ;;  %s2291_s22 = int_to_ptr.vmem [resolvable:$true] %s1407_s22  ;;  %s1850_s21 = int_to_ptr.vmem [resolvable:$false] %s1849_s21 }
  0x1b   : > { %1647 = vmatpush3.msra.mxu0 %v442_v3  ;;  %v1478_v45 = vld [vmem:[%s2336_s6] ss:$0 sm:$0xff]  ;;  %v1818_v6 = vld [vmem:[%s2339_s9 + $0x10] sm:$0xff]   ;;  %s1845_s15 = scalar_lea.vmem %s2291_s22, 128  ;;  %s1851_s27 = scalar_lea.vmem %s1850_s21, 256 }
  0x1c   : > { %1649 = vmatmul.mubr.msk.f32.vlgmr.msra.gmra.mxu0 %vm443_vm0, %v2040_v1  ;;  %1665 = vmatprep.subr.bf16.mxu0 %v1907_v5  ;;  %v1808_v55 = vld [vmem:[%s2337_s7 + $0x20] sm:$0xff]   ;;  %p1846_p11 = scmp.ne.s32.totalorder %s2291_s22, %s1845_s15  ;;  %p1852_p0 = scmp.lt.s32.totalorder %s2291_s22, %s1850_s21 }
  0x1d   : > { %1651 = vmatprep.mubr.msk.f32.mxu0 %vm443_vm0, %v2048_v2  ;;  %1666 = vmatpush3.bf16.msra.mxu0 %v1805_v48  ;;  %v1812_v59 = vld [vmem:[%s2337_s7] sm:$0xff]   ;;  %p1853_p1 = scmp.lt.s32.totalorder %s1851_s27, %s1845_s15 }
  0x1e   : > { %1667 = vmatprep.subr.bf16.mxu0 %v1907_v5  ;;  %v1816_v63 = vld [vmem:[%s2339_s9 + $0x20] sm:$0xff]   ;;  %p1847_p12 = pnand %p1846_p11, %p2018_p5 }
  0x1f   : > { %p1854_p2 = por %p1853_p1, %p1852_p0 }
  0x20   : > { %1652 = vmatmul.mubr.msk.f32.gmra.mxu0 %vm443_vm0, %v2053_v4  ;;  %p1848_p13 = pneg %p1847_p12 }
  0x21   : > { %1681 = vmatprep.mubr.msk.bf16.mxu0 %vm1908_vm1, %v1907_v5  ;;  %1668 = vmatpush3.bf16.msra.mxu0 %v1806_v53 }
  0x22   : > { %1669 = vmatprep.subr.bf16.mxu0 %v1907_v5  ;;  %p1855_p3 = pnand %p1854_p2, %p1848_p13 }
  0x25   : > { %1670 = vmatpush3.bf16.msra.mxu0 %v1807_v54 }
  0x26   : > { %1671 = vmatprep.subr.bf16.mxu0 %v1907_v5 }
  0x29   : > { %1672 = vmatpush3.bf16.msra.mxu0 %v1808_v55 }
  0x2a   : > { %1673 = vmatprep.subr.bf16.mxu0 %v1907_v5 }
  0x2d   : > { %1674 = vmatpush3.bf16.msra.mxu0 %v1809_v56 }
  0x2e   : > { %1675 = vmatprep.subr.bf16.mxu0 %v1907_v5 }
  0x31   : > { %1676 = vmatpush3.bf16.msra.mxu0 %v1810_v57 }
  0x32   : > { %1677 = vmatprep.subr.bf16.mxu0 %v1907_v5 }
  0x35   : > { %1678 = vmatpush3.bf16.msra.mxu0 %v1811_v58 }
  0x36   : > { %1679 = vmatprep.subr.bf16.mxu0 %v1907_v5 }
  0x39   : > { %1680 = vmatpush3.bf16.msra.mxu0 %v1812_v59 }
  0xdc   : > { %v1650_v7 = vpop.f32.mrf.mxu0 }
  0xdd   : > { %v556_v14 = vmul.f32 %v1650_v7, %v1579_v9  ;;  %v550_v22 = vmul.f32 %v1650_v7, %v1575_v11 }
  0xde   : > { %v522_v10 = vpop.f32.mrf.mxu0 }
  0xdf   : > { %v555_v18 = vmul.f32 %v1578_v12, %v522_v10  ;;  %v549_v25 = vmul.f32 %v1574_v15, %v522_v10 }
  0xe0   : > { %v1653_v13 = vpop.f32.mrf.mxu0 }
  0xe1   : > { %v558_v16 = vmul.f32 %v1653_v13, %v1575_v11  ;;  %v552_v19 = vmul.f32 %v1653_v13, %v1579_v9 }
  0xe2   : > { %v532_v17 = vpop.f32.mrf.mxu0 }
  0xe3   : > { %v557_v20 = vmul.f32 %v1574_v15, %v532_v17  ;;  %v560_v21 = vadd.f32 %v558_v16, %v556_v14  ;;  %v551_v23 = vmul.f32 %v1578_v12, %v532_v17  ;;  %v554_v26 = vsub.f32 %v550_v22, %v552_v19  ;;  %v1479_v14 = vld [vmem:[%s2341_s11] ss:$0 sm:$0xff] }
  0xe4   : > { %v1480_v16 = vld [vmem:[%s2342_s12] ss:$0 sm:$0xff] }
  0xe5   : > { %v559_v24 = vadd.f32 %v557_v20, %v555_v18  ;;  %1655 = vmatpush3.msra.mxu1 %v560_v21  ;;  %v553_v27 = vsub.f32 %v549_v25, %v551_v23  ;;  %v1819_v20 = vld [vmem:[%s2339_s9 + $0x8] sm:$0xff]   ;;  %v1820_v21 = vld [vmem:[%s2339_s9] sm:$0xff]  }
  0xe6   : > { %1656 = vmatprep.subr.mxu1 %v1907_v5  ;;  %v1481_v22 = vld [vmem:[%s2338_s8] ss:$0 sm:$0xff] }
  0xe7   : > { %1657 = vmatpush3.msra.mxu1 %v559_v24 }
  0xe8   : > { %1658 = vmatprep.subr.mxu1 %v1907_v5 }
  0xe9   : > { %1659 = vmatpush3.msra.mxu1 %v554_v26 }
  0xea   : > { %1660 = vmatprep.subr.mxu1 %v1907_v5 }
  0xeb   : > { %1661 = vmatpush3.msra.mxu1 %v553_v27 }
  0xec   : > { %1663 = vmatmul.mubr.msk.f32.vlgmr.msra.gmra.mxu1 %vm561_vm2, %v2078_v28  ;;  %1685 = vmatprep.subr.bf16.mxu1 %v1907_v5 }
  0xed   : > { %1701 = vmatprep.mubr.msk.bf16.mxu1 %vm1908_vm1, %v1907_v5  ;;  %1686 = vmatpush3.bf16.msra.mxu1 %v1813_v60 }
  0xee   : > { %1687 = vmatprep.subr.bf16.mxu1 %v1907_v5 }
  0xf1   : > { %1688 = vmatpush3.bf16.msra.mxu1 %v1814_v61 }
  0xf2   : > { %1689 = vmatprep.subr.bf16.mxu1 %v1907_v5 }
  0xf5   : > { %1690 = vmatpush3.bf16.msra.mxu1 %v1815_v62 }
  0xf6   : > { %1691 = vmatprep.subr.bf16.mxu1 %v1907_v5 }
  0xf9   : > { %1692 = vmatpush3.bf16.msra.mxu1 %v1816_v63 }
  0xfa   : > { %1693 = vmatprep.subr.bf16.mxu1 %v1907_v5 }
 0x1ac   : > { %v631_v29 = vpop.f32.mrf.mxu1 }
 0x1ad   : > { %v632_v30 = vadd.f32 %v631_v29, %v442_v3  ;;  %v1817_v3 = vld [vmem:[%s2339_s9 + $0x18] sm:$0xff]  }
 0x1ae   : > { %v1664_v31 = vpop.f32.mrf.mxu1  ;;  %1694 = vmatpush3.bf16.msra.mxu1 %v1817_v3 }
 0x1af   : > { %637 = vadd.xlane.f32.xlu0 %v632_v30  ;;  %1695 = vmatprep.subr.bf16.mxu1 %v1907_v5 }
 0x1b2   : > { %1696 = vmatpush3.bf16.msra.mxu1 %v1818_v6 }
 0x1b3   : > { %1697 = vmatprep.subr.bf16.mxu1 %v1907_v5 }
 0x1b6   : > { %1698 = vmatpush3.bf16.msra.mxu1 %v1819_v20  ;;  %v1822_v20 = vld [vmem:[%s2337_s7 + $0x70] sm:$0xff]  }
 0x1b7   : > { %1699 = vmatprep.subr.bf16.mxu1 %v1907_v5 }
 0x1ba   : > { %1700 = vmatpush3.bf16.msra.mxu1 %v1820_v21  ;;  %v1823_v21 = vld [vmem:[%s2337_s7 + $0x68] sm:$0xff]  }
 0x1bb   : > { %1713 = vmatprep.subr.mxu1 %v1907_v5 }
 0x238   : > { %v638_v32 = vpop.xlane.xlu0 %637 }
 0x239   : > { %v639_v33 = vmul.f32 0.03125, %v638_v32 }
 0x23b   : > { %v640_v34 = vsub.f32 %v632_v30, %v639_v33  ;;  %v644_v36 = vmul.f32 %v639_v33, %v639_v33  ;;  %v1490_v30 = vld [vmem:[%s2340_s10] ss:$0 sm:$0xff] }
 0x23d   : > { %v641_v35 = vmul.f32 %v640_v34, %v640_v34  ;;  %v645_v37 = vmul.f32 96.0, %v644_v36 }
 0x23f   : > { %642 = vadd.xlane.f32.xlu0 %v641_v35 }
 0x2c8   : > { %v643_v38 = vpop.xlane.xlu0 %642 }
 0x2c9   : > { %v646_v39 = vsub.f32 %v643_v38, %v645_v37  ;;  %v1589_v37 = vld [vmem:[%s2334_s4 + $0x8] sm:$0xff]  }
 0x2cb   : > { %v647_v40 = vmul.f32 0.03125, %v646_v39  ;;  %v1587_v39 = vunpack.c.h.bf16 %v1589_v37 }
 0x2cd   : > { %v648_v41 = vadd.f32 1e-12, %v647_v40 }
 0x2cf   : > { %1837 = vrsqrt.f32 %v648_v41 }
 0x2dc   : > { %v1838_v42 = vpop.eup %1837 }
 0x2dd   : > { %v650_v44 = vmul.f32 %v1838_v42, %v640_v34  ;;  %v1586_v42 = vunpack.c.l.bf16 %v1589_v37 }
 0x2df   : > { %v657_v46 = vmul.f32 %v1477_v43, %v650_v44 }
 0x2e1   : > { %v2092_v47 = vadd.f32 %v1478_v45, %v657_v46 }
 0x2e3   : > { %667 = vadd.xlane.f32.xlu1 %v2092_v47 }
 0x36c   : > { %v668_v49 = vpop.xlane.xlu1 %667 }
 0x36d   : > { %v669_v50 = vmul.f32 0.03125, %v668_v49 }
 0x36f   : > { %v670_v51 = vsub.f32 %v2092_v47, %v669_v50  ;;  %v674_v7 = vmul.f32 %v669_v50, %v669_v50 }
 0x371   : > { %v671_v52 = vmul.f32 %v670_v51, %v670_v51  ;;  %v675_v8 = vmul.f32 96.0, %v674_v7 }
 0x373   : > { %672 = vadd.xlane.f32.xlu1 %v671_v52 }
 0x3fc   : > { %v673_v9 = vpop.xlane.xlu1 %672 }
 0x3fd   : > { %v676_v10 = vsub.f32 %v673_v9, %v675_v8 }
 0x3ff   : > { %v677_v11 = vmul.f32 0.03125, %v676_v10  ;;  %v1510_v10 = vld [vmem:[%s2335_s5 + $0x1] ss:$0 sm:$0xff] }
 0x401   : > { %v678_v12 = vadd.f32 1e-12, %v677_v11 }
 0x403   : > { %1839 = vrsqrt.f32 %v678_v12  ;;  %v1511_v12 = vld [vmem:[%s2336_s6 + $0x1] ss:$0 sm:$0xff] }
 0x410   : > { %v1840_v13 = vpop.eup %1839 }
 0x411   : > { %v680_v15 = vmul.f32 %v1840_v13, %v670_v51 }
 0x413   : > { %v687_v17 = vmul.f32 %v1479_v14, %v680_v15  ;;  %v1821_v15 = vld [vmem:[%s2337_s7 + $0x78] sm:$0xff]  }
 0x415   : > { %v694_v18 = vadd.f32 %v1480_v16, %v687_v17 }
 0x417   : > { %v711_v19 = vpack.c.bf16 %v694_v18, %v694_v18 }
 0x419   : > { %1682 = vmatmul.mubr.bf16.vlgmr.msra.gmra.mxu0 %v711_v19 }
 0x41a   : > { %1707 = vmatprep.mubr.msk.f32.mxu0 %vm443_vm0, %v2032_v0 }
 0x4d9   : > { %v801_v23 = vpop.f32.mrf.mxu0 }
 0x4da   : > { %v802_v0 = vadd.f32 %v1481_v22, %v801_v23  ;;  %v1824_v22 = vld [vmem:[%s2337_s7 + $0x60] sm:$0xff]   ;;  %v1825_v23 = vld [vmem:[%s2337_s7 + $0x58] sm:$0xff]  }
 0x4db   : > { %v1683_v24 = vpop.f32.mrf.mxu0 }
 0x4dc   : > { %v807_v25 = vmax.f32 %v802_v0, 0.0  ;;  %v1826_v0 = vld [vmem:[%s2337_s7 + $0x50] sm:$0xff]   ;;  %v1827_v24 = vld [vmem:[%s2337_s7 + $0x48] sm:$0xff]  }
 0x4dd   : > { %v804_v26 = vpop.f32.mrf.mxu0 }
 0x4de   : > { %v824_v27 = vpack.c.bf16 %v807_v25, %v807_v25  ;;  %v1828_v25 = vld [vmem:[%s2337_s7 + $0x40] sm:$0xff]   ;;  %v1829_v26 = vld [vmem:[%s2339_s9 + $0x78] sm:$0xff]  }
 0x4df   : > { %v1684_v29 = vpop.f32.mrf.mxu0 }
 0x4e0   : > { %1702 = vmatmul.mubr.bf16.vlgmr.msra.gmra.mxu1 %v824_v27  ;;  %v1830_v27 = vld [vmem:[%s2339_s9 + $0x70] sm:$0xff]   ;;  %v1831_v29 = vld [vmem:[%s2339_s9 + $0x68] sm:$0xff]  }
 0x4e1   : > { %1721 = vmatprep.mubr.msk.f32.mxu1 %vm1908_vm1, %v1907_v5 }
 0x5a0   : > { %v914_v31 = vpop.f32.mrf.mxu1 }
 0x5a1   : > { %v915_v32 = vadd.f32 %v1490_v30, %v914_v31  ;;  %v1832_v30 = vld [vmem:[%s2339_s9 + $0x60] sm:$0xff]   ;;  %v1833_v31 = vld [vmem:[%s2339_s9 + $0x58] sm:$0xff]  }
 0x5a2   : > { %v1703_v33 = vpop.f32.mrf.mxu1 }
 0x5a3   : > { %v920_v34 = vadd.f32 %v915_v32, %v2092_v47  ;;  %v1834_v32 = vld [vmem:[%s2339_s9 + $0x50] sm:$0xff]  }
 0x5a4   : > { %v917_v35 = vpop.f32.mrf.mxu1 }
 0x5a5   : > { %1705 = vmatprep.subr.mxu0 %v920_v34 }
 0x5a6   : > { %v1704_v36 = vpop.f32.mrf.mxu1  ;;  %1706 = vmatpush3.msra.mxu0 %v920_v34 }
 0x5a7   : > { %1708 = vmatmul.mubr.msk.f32.vlgmr.msra.gmra.mxu0 %vm443_vm0, %v2040_v1  ;;  %1724 = vmatprep.subr.bf16.mxu0 %v1907_v5  ;;  %v1588_v1 = vld [vmem:[%s2333_s3 + $0x8] sm:$0xff]  }
 0x5a8   : > { %1710 = vmatprep.mubr.msk.f32.mxu0 %vm443_vm0, %v2048_v2  ;;  %v1583_v41 = vunpack.c.h.bf16 %v1588_v1  ;;  %v1582_v44 = vunpack.c.l.bf16 %v1588_v1  ;;  %1725 = vmatpush3.bf16.msra.mxu0 %v1821_v15 }
 0x5a9   : > { %1726 = vmatprep.subr.bf16.mxu0 %v1907_v5 }
 0x5ab   : > { %1711 = vmatmul.mubr.msk.f32.gmra.mxu0 %vm443_vm0, %v2053_v4 }
 0x5ac   : > { %1740 = vmatprep.mubr.msk.bf16.mxu0 %vm1908_vm1, %v1907_v5  ;;  %1727 = vmatpush3.bf16.msra.mxu0 %v1822_v20 }
 0x5ad   : > { %1728 = vmatprep.subr.bf16.mxu0 %v1907_v5 }
 0x5b0   : > { %1729 = vmatpush3.bf16.msra.mxu0 %v1823_v21 }
 0x5b1   : > { %1730 = vmatprep.subr.bf16.mxu0 %v1907_v5 }
 0x5b4   : > { %1731 = vmatpush3.bf16.msra.mxu0 %v1824_v22 }
 0x5b5   : > { %1732 = vmatprep.subr.bf16.mxu0 %v1907_v5 }
 0x5b8   : > { %1733 = vmatpush3.bf16.msra.mxu0 %v1825_v23 }
 0x5b9   : > { %1734 = vmatprep.subr.bf16.mxu0 %v1907_v5 }
 0x5bc   : > { %1735 = vmatpush3.bf16.msra.mxu0 %v1826_v0 }
 0x5bd   : > { %1736 = vmatprep.subr.bf16.mxu0 %v1907_v5 }
 0x5c0   : > { %1737 = vmatpush3.bf16.msra.mxu0 %v1827_v24 }
 0x5c1   : > { %1738 = vmatprep.subr.bf16.mxu0 %v1907_v5 }
 0x5c4   : > { %1739 = vmatpush3.bf16.msra.mxu0 %v1828_v25 }
 0x667   : > { %v1709_v38 = vpop.f32.mrf.mxu0 }
 0x668   : > { %v1023_v43 = vmul.f32 %v1709_v38, %v1587_v39  ;;  %v1017_v50 = vmul.f32 %v1709_v38, %v1583_v41 }
 0x669   : > { %v987_v40 = vpop.f32.mrf.mxu0 }
 0x66a   : > { %v1022_v46 = vmul.f32 %v1586_v42, %v987_v40  ;;  %v1016_v53 = vmul.f32 %v1582_v44, %v987_v40 }
 0x66b   : > { %v1712_v2 = vpop.f32.mrf.mxu0 }
 0x66c   : > { %v1025_v4 = vmul.f32 %v1712_v2, %v1583_v41  ;;  %v1019_v47 = vmul.f32 %v1712_v2, %v1587_v39  ;;  %v1514_v39 = vld [vmem:[%s2341_s11 + $0x1] ss:$0 sm:$0xff] }
 0x66d   : > { %v997_v45 = vpop.f32.mrf.mxu0  ;;  %v1515_v41 = vld [vmem:[%s2342_s12 + $0x1] ss:$0 sm:$0xff] }
 0x66e   : > { %v1027_v48 = vadd.f32 %v1025_v4, %v1023_v43  ;;  %v1024_v49 = vmul.f32 %v1582_v44, %v997_v45  ;;  %v1018_v51 = vmul.f32 %v1586_v42, %v997_v45  ;;  %v1021_v54 = vsub.f32 %v1017_v50, %v1019_v47  ;;  %v1835_v44 = vld [vmem:[%s2339_s9 + $0x48] sm:$0xff]   ;;  %v1836_v4 = vld [vmem:[%s2339_s9 + $0x40] sm:$0xff]  }
 0x66f   : > { %v1533_v45 = vld [vmem:[%s2338_s8 + $0x1] ss:$0 sm:$0xff] }
 0x670   : > { %v1026_v52 = vadd.f32 %v1024_v49, %v1022_v46  ;;  %1714 = vmatpush3.msra.mxu1 %v1027_v48  ;;  %v1020_v55 = vsub.f32 %v1016_v53, %v1018_v51 }
 0x671   : > { %1715 = vmatprep.subr.mxu1 %v1907_v5 }
 0x672   : > { %1716 = vmatpush3.msra.mxu1 %v1026_v52 }
 0x673   : > { %1717 = vmatprep.subr.mxu1 %v1907_v5 }
 0x674   : > { %1718 = vmatpush3.msra.mxu1 %v1021_v54 }
 0x675   : > { %1719 = vmatprep.subr.mxu1 %v1907_v5 }
 0x676   : > { %1720 = vmatpush3.msra.mxu1 %v1020_v55 }
 0x677   : > { %1722 = vmatmul.mubr.msk.f32.vlgmr.msra.gmra.mxu1 %vm561_vm2, %v2078_v28  ;;  %1744 = vmatprep.subr.bf16.mxu1 %v1907_v5 }
 0x678   : > { %1760 = vmatprep.mubr.msk.bf16.mxu1 %vm1908_vm1, %v1907_v5  ;;  %1745 = vmatpush3.bf16.msra.mxu1 %v1829_v26 }
 0x679   : > { %1746 = vmatprep.subr.bf16.mxu1 %v1907_v5 }
 0x67c   : > { %1747 = vmatpush3.bf16.msra.mxu1 %v1830_v27 }
 0x67d   : > { %1748 = vmatprep.subr.bf16.mxu1 %v1907_v5 }
 0x680   : > { %1749 = vmatpush3.bf16.msra.mxu1 %v1831_v29 }
 0x681   : > { %1750 = vmatprep.subr.bf16.mxu1 %v1907_v5 }
 0x684   : > { %1751 = vmatpush3.bf16.msra.mxu1 %v1832_v30 }
 0x685   : > { %1752 = vmatprep.subr.bf16.mxu1 %v1907_v5 }
 0x688   : > { %1753 = vmatpush3.bf16.msra.mxu1 %v1833_v31 }
 0x689   : > { %1754 = vmatprep.subr.bf16.mxu1 %v1907_v5 }
 0x68c   : > { %1755 = vmatpush3.bf16.msra.mxu1 %v1834_v32 }
 0x68d   : > { %1756 = vmatprep.subr.bf16.mxu1 %v1907_v5 }
 0x690   : > { %1757 = vmatpush3.bf16.msra.mxu1 %v1835_v44 }
 0x691   : > { %1758 = vmatprep.subr.bf16.mxu1 %v1907_v5  ;;  %v1559_v5 = vld [vmem:[%s2340_s10 + $0x1] ss:$0 sm:$0xff] }
 0x694   : > { %1759 = vmatpush3.bf16.msra.mxu1 %v1836_v4 }
 0x737   : > { %v1094_v56 = vpop.f32.mrf.mxu1 }
 0x738   : > { %v1095_v57 = vadd.f32 %v1094_v56, %v920_v34 }
 0x739   : > { %v1723_v58 = vpop.f32.mrf.mxu1 }
 0x73a   : > { %1102 = vadd.xlane.f32.xlu0 %v1095_v57 }
 0x7c3   : > { %v1103_v59 = vpop.xlane.xlu0 %1102 }
 0x7c4   : > { %v1104_v60 = vmul.f32 0.03125, %v1103_v59 }
 0x7c6   : > { %v1105_v61 = vsub.f32 %v1095_v57, %v1104_v60  ;;  %v1109_v63 = vmul.f32 %v1104_v60, %v1104_v60 }
 0x7c8   : > { %v1106_v62 = vmul.f32 %v1105_v61, %v1105_v61  ;;  %v1110_v3 = vmul.f32 96.0, %v1109_v63 }
 0x7ca   : > { %1107 = vadd.xlane.f32.xlu1 %v1106_v62 }
 0x853   : > { %v1108_v6 = vpop.xlane.xlu1 %1107 }
 0x854   : > { %v1111_v7 = vsub.f32 %v1108_v6, %v1110_v3 }
 0x856   : > { %v1112_v8 = vmul.f32 0.03125, %v1111_v7 }
 0x858   : > { %v1113_v28 = vadd.f32 1e-12, %v1112_v8 }
 0x85a   : > { %1841 = vrsqrt.f32 %v1113_v28 }
 0x867   : > { %v1842_v9 = vpop.eup %1841 }
 0x868   : > { %v1115_v11 = vmul.f32 %v1842_v9, %v1105_v61 }
 0x86a   : > { %v1122_v13 = vmul.f32 %v1510_v10, %v1115_v11 }
 0x86c   : > { %v2205_v14 = vadd.f32 %v1511_v12, %v1122_v13 }
 0x86e   : > { %1134 = vadd.xlane.f32.xlu0 %v2205_v14 }
 0x8f7   : > { %v1135_v16 = vpop.xlane.xlu0 %1134 }
 0x8f8   : > { %v1136_v17 = vmul.f32 0.03125, %v1135_v16 }
 0x8fa   : > { %v1137_v18 = vsub.f32 %v2205_v14, %v1136_v17  ;;  %v1141_v33 = vmul.f32 %v1136_v17, %v1136_v17 }
 0x8fc   : > { %v1138_v19 = vmul.f32 %v1137_v18, %v1137_v18  ;;  %v1142_v34 = vmul.f32 96.0, %v1141_v33 }
 0x8fe   : > { %1139 = vadd.xlane.f32.xlu1 %v1138_v19 }
 0x987   : > { %v1140_v35 = vpop.xlane.xlu1 %1139 }
 0x988   : > { %v1143_v36 = vsub.f32 %v1140_v35, %v1142_v34 }
 0x98a   : > { %v1144_v37 = vmul.f32 0.03125, %v1143_v36 }
 0x98c   : > { %v1145_v38 = vadd.f32 1e-12, %v1144_v37 }
 0x98e   : > { %1843 = vrsqrt.f32 %v1145_v38 }
 0x99b   : > { %v1844_v1 = vpop.eup %1843 }
 0x99c   : > { %v1147_v40 = vmul.f32 %v1844_v1, %v1137_v18 }
 0x99e   : > { %v1154_v42 = vmul.f32 %v1514_v39, %v1147_v40 }
 0x9a0   : > { %v1161_v2 = vadd.f32 %v1515_v41, %v1154_v42 }
 0x9a2   : > { %v1179_v43 = vpack.c.bf16 %v1161_v2, %v1161_v2 }
 0x9a4   : > { %1741 = vmatmul.mubr.bf16.vlgmr.msra.gmra.mxu0 %v1179_v43 }
 0xa64   : > { %v1270_v46 = vpop.f32.mrf.mxu0 }
 0xa65   : > { %v1271_v47 = vadd.f32 %v1533_v45, %v1270_v46 }
 0xa66   : > { %v1742_v48 = vpop.f32.mrf.mxu0 }
 0xa67   : > { %v1276_v49 = vmax.f32 %v1271_v47, 0.0 }
 0xa68   : > { %v1273_v50 = vpop.f32.mrf.mxu0 }
 0xa69   : > { %v1294_v51 = vpack.c.bf16 %v1276_v49, %v1276_v49 }
 0xa6a   : > { %v1743_v52 = vpop.f32.mrf.mxu0 }
 0xa6b   : > { %1761 = vmatmul.mubr.bf16.vlgmr.msra.gmra.mxu1 %v1294_v51 }
 0xb2b   : > { %v1385_v53 = vpop.f32.mrf.mxu1 }
 0xb2c   : > { %v1386_v54 = vadd.f32 %v1559_v5, %v1385_v53 }
 0xb2d   : > { %v1762_v55 = vpop.f32.mrf.mxu1 }
 0xb2e   : > { %v1391_v56 = vadd.f32 %v1386_v54, %v2205_v14 }
 0xb2f   : > { %v1388_v57 = vpop.f32.mrf.mxu1 }
 0xb30   : > { %1392 = vst [vmem:[%s431_s17] sm:$0xff] %v1391_v56 }
 0xb31   : > { %v1763_v58 = vpop.f32.mrf.mxu1 }
 0xb32   : > { %1858 = shalt.err (!%p1855_p3)
}
 0xb33   : > { %s1859_s14 = scalar_lea.hbm %s2289_s30, 128  ;;  %s1863_s23 = scalar_lea.hbm %s2343_s13, 256 }
 0xb34   : > { %p1860_p4 = scmp.ne.s32.totalorder %s2289_s30, %s1859_s14  ;;  %p1864_p9 = scmp.lt.s32.totalorder %s2289_s30, %s2343_s13 }
 0xb35   : > { %p1865_p10 = scmp.lt.s32.totalorder %s1863_s23, %s1859_s14 }
 0xb36   : > { %p1861_p7 = pnand %p1860_p4, %p2018_p5 }
 0xb37   : > { %p1866_p11 = por %p1865_p10, %p1864_p9 }
 0xb38   : > { %p1862_p8 = pneg %p1861_p7 }
 0xb3a   : > { %p1867_p12 = pnand %p1866_p11, %p1862_p8 }
 0xb3c   : > { %1870 = shalt.err (!%p1867_p12)
}
 0xb3d   : > { %1764 = dma.vmem_to_hbm [thread:$0]  (%p2018_p5), %s2291_s22, 128, %s2289_s30, %s1394_s29  }
 0xb3e PF: > { %p1770_p13 = scmp.ge.s32.totalorder %s1905_s28, 2  ;;  %s1419_s15 = sand.u32 1, %s1893_s25  }
 0xb3f   : > { %s1420_s21 = scalar_lea.sflag [#allocation3], %s1419_s15 }
 0xb40   : > { %p1767_p0 = pnand %p1770_p13, %p2022_p6 }
 0xb42   : > { %p1768_p1 = pneg %p1767_p0 }
 0xb44   : > { %1888 = dma.done.wait (%p1768_p1), %s1420_s21, 128  }
 0xb45   : > { %1890 = vsyncadd (%p1768_p1), %s1420_s21, 4294967168  ;;  %s2352_s28 = sld [smem:[#allocation6_spill]]  ;;  %s2355_s25 = smov %s1897_s26 }
 0xb46   : > { %s2353_s27 = sld [smem:[#allocation5_spill]] }
 0xb47   : > { %s2354_s14 = sld [smem:[#allocation7_spill]] }
 0xb4b   : > { %p23_p2 = scmp.ge.s32.totalorder %s2352_s28, 4  }
 0xb4c   : > { %s2356_s26 = smov %s2353_s27 }
 0xb4d   : > { %s2357_s27 = smov %s2354_s14  ;;  %25 = sbr.rel (!%p23_p2) target bundleno = 3 (0x3), region = 117 }
 0xb52   :  { %1425 = vsyncpa [#allocation3], 1 }
 0xb53   :  { %1427 = vsyncpa [#allocation3 + $0x1], 1 }

// kernel: encoder_forward.1
= control target key start
LH: loop header
LB: loop body
LE: loop exit
PB: predicated region body
PF: predicated region fallthrough
CT: control target
= control target key end

     0   :  { %18 = vsyncpa [#allocation3], 0  ;;  %s2330_s0 = inlined_call_operand.vmem [shape: f32[8,256], index: 0, kind: input, shape index: {}]   ;;  %s2331_s1 = inlined_call_operand.vmem [shape: f32[32,8], index: 1, kind: input, shape index: {}]   ;;  %s2332_s2 = inlined_call_operand.vmem [shape: f32[8,32], index: 2, kind: input, shape index: {}]   ;;  %s2333_s3 = inlined_call_operand.vmem [shape: bf16[2,16,128], index: 3, kind: input, shape index: {}]   ;;  %s2334_s4 = inlined_call_operand.vmem [shape: bf16[2,16,128], index: 4, kind: input, shape index: {}]   ;;  %s2335_s5 = inlined_call_operand.vmem [shape: f32[2,1,128], index: 5, kind: input, shape index: {}]   ;;  %s2336_s6 = inlined_call_operand.vmem [shape: f32[2,1,128], index: 6, kind: input, shape index: {}]   ;;  %s2337_s7 = inlined_call_operand.vmem [shape: bf16[2,128,128], index: 7, kind: input, shape index: {}]   ;;  %s2338_s8 = inlined_call_operand.vmem [shape: f32[2,1,128], index: 8, kind: input, shape index: {}]   ;;  %s2339_s9 = inlined_call_operand.vmem [shape: bf16[2,128,128], index: 9, kind: input, shape index: {}]   ;;  %s2340_s10 = inlined_call_operand.vmem [shape: f32[2,1,128], index: 10, kind: input, shape index: {}]   ;;  %s2341_s11 = inlined_call_operand.vmem [shape: f32[2,1,128], index: 11, kind: input, shape index: {}]   ;;  %s2342_s12 = inlined_call_operand.vmem [shape: f32[2,1,128], index: 12, kind: input, shape index: {}]   ;;  %s2343_s13 = inlined_call_operand.hbm [shape: f32[8,256], index: 13, kind: output, shape index: {}]  }
   0x1   :  { %20 = vsyncpa [#allocation3 + $0x1], 0  ;;  %s1980_s25 = smov 0   ;;  %s1982_s26 = smov 0  }
   0x2   :  { %s1984_s27 = smov 0   ;;  %s1986_s28 = smov 0  }
   0x3 LB: > { %2347 = sst [smem:[#allocation5_spill]] %s1901_s27  ;;  %s2001_s29 = sadd.s32 4294967295, %s1905_s28   ;;  %s1905_s28 = sphi %s1986_s28, %s2352_s28   ;;  %s1901_s27 = sphi %s1984_s27, %s2357_s27   ;;  %s1897_s26 = sphi %s1982_s26, %s2356_s26   ;;  %s1893_s25 = sphi %s1980_s25, %s2355_s25  }
   0x4   : > { %s1466_s30 = sadd.s32 4294967294, %s1905_s28   ;;  %s2005_s14 = sadd.s32 1, %s1905_s28  }
   0x5   : > { %2348 = sst [smem:[#allocation6_spill]] %s2005_s14  ;;  %s311_s15 = sadd.s32 1, %s1901_s27 }
   0x6   : > { %s308_s16 = ssub.s32 %s1905_s28, %s2005_s14  ;;  %p321_p0 = scmp.ne.s32.totalorder %s1901_s27, %s1897_s26 }
   0x7   : > { %p309_p1 = scmp.eq.s32.totalorder %s308_s16, 0  ;;  %p322_p2 = scmp.eq.s32.totalorder %s2001_s29, 1 }
   0x8   : > { %p327_p3 = scmp.ne.s32.totalorder %s1897_s26, %s1893_s25  ;;  %p328_p4 = scmp.eq.s32.totalorder %s1466_s30, 1 }
   0x9   : > { %s2016_s17 = scalar_select %p309_p1, %s1901_s27, %s311_s15  }
   0xa   : > { %p2018_p5 = por %p322_p2, %p321_p0  ;;  %p2022_p6 = por %p328_p4, %p327_p3 }
   0xb   : > { %2349 = sst [smem:[#allocation7_spill]] %s2016_s17  ;;  %p1469_p7 = scmp.ge.s32.totalorder %s1905_s28, 1 }
   0xc   : > { %p389_p8 = scmp.lt.s32.totalorder %s1905_s28, 3 }
   0xe   : > { %p390_p9 = pnand %p1469_p7, %p389_p8 }
   0xf   : > { %p432_p10 = scmp.lt.s32.totalorder (!%p390_p9), %s2001_s29, 1  ;;  %s429_s16 = sand.u32 (!%p390_p9), 1, %s1897_s26  }
  0x10   : > { %393 = sbr.rel (%p390_p9) target bundleno = 2878 (0xb3e), region = 72  ;;  %s1470_s20 = sshll.u32 (!%p390_p9), %s429_s16, 3 }
  0x11   : > { %s1569_s14 = sshll.u32 (!%p390_p9), %s2001_s29, 7 }
  0x12   : > { %s2289_s30 = scalar_lea.hbm (!%p390_p9), %s2343_s13, %s1569_s14 }
  0x15   : > { %v2032_v0 = vld [vmem:[%s2331_s1] sm:$0xff]  ;;  %vm443_vm0 = vcmask 64512   ;;  %s433_s22 = scalar_select %p432_p10, %s2001_s29, 1  ;;  %v2040_v1 = vld [vmem:[%s2331_s1 + $0x8] sm:$0xff]  ;;  %v2048_v2 = vld [vmem:[%s2331_s1 + $0x10] sm:$0xff]  ;;  %v1907_v5 = vmov 0.0  }
  0x16   : > { %1648 = vmatprep.mubr.msk.f32.mxu0 %vm443_vm0, %v2032_v0  ;;  %v2053_v4 = vld [vmem:[%s2331_s1 + $0x18] sm:$0xff]  ;;  %1654 = vmatprep.subr.mxu1 %v1907_v5  ;;  %vm1908_vm1 = vmmov 0   ;;  %v1577_v6 = vld [vmem:[%s2334_s4] sm:$0xff]   ;;  %vm561_vm2 = vcmask 261120   ;;  %v1806_v53 = vld [vmem:[%s2337_s7 + $0x30] sm:$0xff]   ;;  %s1394_s29 = scalar_lea.sflag [#allocation3], %s429_s16 }
  0x17   : > { %s1471_s23 = sshll.u32 %s433_s22, 3  ;;  %1662 = vmatprep.mubr.msk.f32.mxu1 %vm1908_vm1, %v1907_v5  ;;  %v1573_v8 = vld [vmem:[%s2333_s3] sm:$0xff]   ;;  %v1579_v9 = vunpack.c.h.bf16 %v1577_v6  ;;  %v1578_v12 = vunpack.c.l.bf16 %v1577_v6  ;;  %v1805_v48 = vld [vmem:[%s2337_s7 + $0x38] sm:$0xff]   ;;  %v1807_v54 = vld [vmem:[%s2337_s7 + $0x28] sm:$0xff]  }
  0x18   : > { %s435_s17 = scalar_lea.vmem %s2330_s0, %s1471_s23  ;;  %v1575_v11 = vunpack.c.h.bf16 %v1573_v8  ;;  %v1574_v15 = vunpack.c.l.bf16 %v1573_v8  ;;  %v2078_v28 = vld [vmem:[%s2332_s2] sm:$0xff]  ;;  %v1809_v56 = vld [vmem:[%s2337_s7 + $0x18] sm:$0xff]   ;;  %v1810_v57 = vld [vmem:[%s2337_s7 + $0x10] sm:$0xff]  }
  0x19   : > { %v442_v3 = vld [vmem:[%s435_s17] sm:$0xff]  ;;  %v1811_v58 = vld [vmem:[%s2337_s7 + $0x8] sm:$0xff]   ;;  %v1813_v60 = vld [vmem:[%s2339_s9 + $0x38] sm:$0xff]   ;;  %s431_s17 = scalar_lea.vmem [#allocation2], %s1470_s20  ;;  %s1909_s20 = smov [#allocation2]  }
  0x1a   : > { %1646 = vmatprep.subr.mxu0 %v442_v3  ;;  %v1477_v43 = vld [vmem:[%s2335_s5] ss:$0 sm:$0xff]  ;;  %v1814_v61 = vld [vmem:[%s2339_s9 + $0x30] sm:$0xff]   ;;  %v1815_v62 = vld [vmem:[%s2339_s9 + $0x28] sm:$0xff]   ;;  %s1407_s22 = sshll.u32 %s431_s17, 4  ;;  %s1849_s21 = sshll.u32 %s1909_s20, 4  ;;  %s2291_s22 = int_to_ptr.vmem [resolvable:$true] %s1407_s22  ;;  %s1850_s21 = int_to_ptr.vmem [resolvable:$false] %s1849_s21 }
  0x1b   : > { %1647 = vmatpush3.msra.mxu0 %v442_v3  ;;  %v1478_v45 = vld [vmem:[%s2336_s6] ss:$0 sm:$0xff]  ;;  %v1818_v6 = vld [vmem:[%s2339_s9 + $0x10] sm:$0xff]   ;;  %s1845_s15 = scalar_lea.vmem %s2291_s22, 128  ;;  %s1851_s27 = scalar_lea.vmem %s1850_s21, 256 }
  0x1c   : > { %1649 = vmatmul.mubr.msk.f32.vlgmr.msra.gmra.mxu0 %vm443_vm0, %v2040_v1  ;;  %1665 = vmatprep.subr.bf16.mxu0 %v1907_v5  ;;  %v1808_v55 = vld [vmem:[%s2337_s7 + $0x20] sm:$0xff]   ;;  %p1846_p11 = scmp.ne.s32.totalorder %s2291_s22, %s1845_s15  ;;  %p1852_p0 = scmp.lt.s32.totalorder %s2291_s22, %s1850_s21 }
  0x1d   : > { %1651 = vmatprep.mubr.msk.f32.mxu0 %vm443_vm0, %v2048_v2  ;;  %1666 = vmatpush3.bf16.msra.mxu0 %v1805_v48  ;;  %v1812_v59 = vld [vmem:[%s2337_s7] sm:$0xff]   ;;  %p1853_p1 = scmp.lt.s32.totalorder %s1851_s27, %s1845_s15 }
  0x1e   : > { %1667 = vmatprep.subr.bf16.mxu0 %v1907_v5  ;;  %v1816_v63 = vld [vmem:[%s2339_s9 + $0x20] sm:$0xff]   ;;  %p1847_p12 = pnand %p1846_p11, %p2018_p5 }
  0x1f   : > { %p1854_p2 = por %p1853_p1, %p1852_p0 }
  0x20   : > { %1652 = vmatmul.mubr.msk.f32.gmra.mxu0 %vm443_vm0, %v2053_v4  ;;  %p1848_p13 = pneg %p1847_p12 }
  0x21   : > { %1681 = vmatprep.mubr.msk.bf16.mxu0 %vm1908_vm1, %v1907_v5  ;;  %1668 = vmatpush3.bf16.msra.mxu0 %v1806_v53 }
  0x22   : > { %1669 = vmatprep.subr.bf16.mxu0 %v1907_v5  ;;  %p1855_p3 = pnand %p1854_p2, %p1848_p13 }
  0x25   : > { %1670 = vmatpush3.bf16.msra.mxu0 %v1807_v54 }
  0x26   : > { %1671 = vmatprep.subr.bf16.mxu0 %v1907_v5 }
  0x29   : > { %1672 = vmatpush3.bf16.msra.mxu0 %v1808_v55 }
  0x2a   : > { %1673 = vmatprep.subr.bf16.mxu0 %v1907_v5 }
  0x2d   : > { %1674 = vmatpush3.bf16.msra.mxu0 %v1809_v56 }
  0x2e   : > { %1675 = vmatprep.subr.bf16.mxu0 %v1907_v5 }
  0x31   : > { %1676 = vmatpush3.bf16.msra.mxu0 %v1810_v57 }
  0x32   : > { %1677 = vmatprep.subr.bf16.mxu0 %v1907_v5 }
  0x35   : > { %1678 = vmatpush3.bf16.msra.mxu0 %v1811_v58 }
  0x36   : > { %1679 = vmatprep.subr.bf16.mxu0 %v1907_v5 }
  0x39   : > { %1680 = vmatpush3.bf16.msra.mxu0 %v1812_v59 }
  0xdc   : > { %v1650_v7 = vpop.f32.mrf.mxu0 }
  0xdd   : > { %v556_v14 = vmul.f32 %v1650_v7, %v1579_v9  ;;  %v550_v22 = vmul.f32 %v1650_v7, %v1575_v11 }
  0xde   : > { %v522_v10 = vpop.f32.mrf.mxu0 }
  0xdf   : > { %v555_v18 = vmul.f32 %v1578_v12, %v522_v10  ;;  %v549_v25 = vmul.f32 %v1574_v15, %v522_v10 }
  0xe0   : > { %v1653_v13 = vpop.f32.mrf.mxu0 }
  0xe1   : > { %v558_v16 = vmul.f32 %v1653_v13, %v1575_v11  ;;  %v552_v19 = vmul.f32 %v1653_v13, %v1579_v9 }
  0xe2   : > { %v532_v17 = vpop.f32.mrf.mxu0 }
  0xe3   : > { %v557_v20 = vmul.f32 %v1574_v15, %v532_v17  ;;  %v560_v21 = vadd.f32 %v558_v16, %v556_v14  ;;  %v551_v23 = vmul.f32 %v1578_v12, %v532_v17  ;;  %v554_v26 = vsub.f32 %v550_v22, %v552_v19  ;;  %v1479_v14 = vld [vmem:[%s2341_s11] ss:$0 sm:$0xff] }
  0xe4   : > { %v1480_v16 = vld [vmem:[%s2342_s12] ss:$0 sm:$0xff] }
  0xe5   : > { %v559_v24 = vadd.f32 %v557_v20, %v555_v18  ;;  %1655 = vmatpush3.msra.mxu1 %v560_v21  ;;  %v553_v27 = vsub.f32 %v549_v25, %v551_v23  ;;  %v1819_v20 = vld [vmem:[%s2339_s9 + $0x8] sm:$0xff]   ;;  %v1820_v21 = vld [vmem:[%s2339_s9] sm:$0xff]  }
  0xe6   : > { %1656 = vmatprep.subr.mxu1 %v1907_v5  ;;  %v1481_v22 = vld [vmem:[%s2338_s8] ss:$0 sm:$0xff] }
  0xe7   : > { %1657 = vmatpush3.msra.mxu1 %v559_v24 }
  0xe8   : > { %1658 = vmatprep.subr.mxu1 %v1907_v5 }
  0xe9   : > { %1659 = vmatpush3.msra.mxu1 %v554_v26 }
  0xea   : > { %1660 = vmatprep.subr.mxu1 %v1907_v5 }
  0xeb   : > { %1661 = vmatpush3.msra.mxu1 %v553_v27 }
  0xec   : > { %1663 = vmatmul.mubr.msk.f32.vlgmr.msra.gmra.mxu1 %vm561_vm2, %v2078_v28  ;;  %1685 = vmatprep.subr.bf16.mxu1 %v1907_v5 }
  0xed   : > { %1701 = vmatprep.mubr.msk.bf16.mxu1 %vm1908_vm1, %v1907_v5  ;;  %1686 = vmatpush3.bf16.msra.mxu1 %v1813_v60 }
  0xee   : > { %1687 = vmatprep.subr.bf16.mxu1 %v1907_v5 }
  0xf1   : > { %1688 = vmatpush3.bf16.msra.mxu1 %v1814_v61 }
  0xf2   : > { %1689 = vmatprep.subr.bf16.mxu1 %v1907_v5 }
  0xf5   : > { %1690 = vmatpush3.bf16.msra.mxu1 %v1815_v62 }
  0xf6   : > { %1691 = vmatprep.subr.bf16.mxu1 %v1907_v5 }
  0xf9   : > { %1692 = vmatpush3.bf16.msra.mxu1 %v1816_v63 }
  0xfa   : > { %1693 = vmatprep.subr.bf16.mxu1 %v1907_v5 }
 0x1ac   : > { %v631_v29 = vpop.f32.mrf.mxu1 }
 0x1ad   : > { %v632_v30 = vadd.f32 %v631_v29, %v442_v3  ;;  %v1817_v3 = vld [vmem:[%s2339_s9 + $0x18] sm:$0xff]  }
 0x1ae   : > { %v1664_v31 = vpop.f32.mrf.mxu1  ;;  %1694 = vmatpush3.bf16.msra.mxu1 %v1817_v3 }
 0x1af   : > { %637 = vadd.xlane.f32.xlu0 %v632_v30  ;;  %1695 = vmatprep.subr.bf16.mxu1 %v1907_v5 }
 0x1b2   : > { %1696 = vmatpush3.bf16.msra.mxu1 %v1818_v6 }
 0x1b3   : > { %1697 = vmatprep.subr.bf16.mxu1 %v1907_v5 }
 0x1b6   : > { %1698 = vmatpush3.bf16.msra.mxu1 %v1819_v20  ;;  %v1822_v20 = vld [vmem:[%s2337_s7 + $0x70] sm:$0xff]  }
 0x1b7   : > { %1699 = vmatprep.subr.bf16.mxu1 %v1907_v5 }
 0x1ba   : > { %1700 = vmatpush3.bf16.msra.mxu1 %v1820_v21  ;;  %v1823_v21 = vld [vmem:[%s2337_s7 + $0x68] sm:$0xff]  }
 0x1bb   : > { %1713 = vmatprep.subr.mxu1 %v1907_v5 }
 0x238   : > { %v638_v32 = vpop.xlane.xlu0 %637 }
 0x239   : > { %v639_v33 = vmul.f32 0.03125, %v638_v32 }
 0x23b   : > { %v640_v34 = vsub.f32 %v632_v30, %v639_v33  ;;  %v644_v36 = vmul.f32 %v639_v33, %v639_v33  ;;  %v1490_v30 = vld [vmem:[%s2340_s10] ss:$0 sm:$0xff] }
 0x23d   : > { %v641_v35 = vmul.f32 %v640_v34, %v640_v34  ;;  %v645_v37 = vmul.f32 96.0, %v644_v36 }
 0x23f   : > { %642 = vadd.xlane.f32.xlu0 %v641_v35 }
 0x2c8   : > { %v643_v38 = vpop.xlane.xlu0 %642 }
 0x2c9   : > { %v646_v39 = vsub.f32 %v643_v38, %v645_v37  ;;  %v1589_v37 = vld [vmem:[%s2334_s4 + $0x8] sm:$0xff]  }
 0x2cb   : > { %v647_v40 = vmul.f32 0.03125, %v646_v39  ;;  %v1587_v39 = vunpack.c.h.bf16 %v1589_v37 }
 0x2cd   : > { %v648_v41 = vadd.f32 1e-12, %v647_v40 }
 0x2cf   : > { %1837 = vrsqrt.f32 %v648_v41 }
 0x2dc   : > { %v1838_v42 = vpop.eup %1837 }
 0x2dd   : > { %v650_v44 = vmul.f32 %v1838_v42, %v640_v34  ;;  %v1586_v42 = vunpack.c.l.bf16 %v1589_v37 }
 0x2df   : > { %v657_v46 = vmul.f32 %v1477_v43, %v650_v44 }
 0x2e1   : > { %v2092_v47 = vadd.f32 %v1478_v45, %v657_v46 }
 0x2e3   : > { %667 = vadd.xlane.f32.xlu1 %v2092_v47 }
 0x36c   : > { %v668_v49 = vpop.xlane.xlu1 %667 }
 0x36d   : > { %v669_v50 = vmul.f32 0.03125, %v668_v49 }
 0x36f   : > { %v670_v51 = vsub.f32 %v2092_v47, %v669_v50  ;;  %v674_v7 = vmul.f32 %v669_v50, %v669_v50 }
 0x371   : > { %v671_v52 = vmul.f32 %v670_v51, %v670_v51  ;;  %v675_v8 = vmul.f32 96.0, %v674_v7 }
 0x373   : > { %672 = vadd.xlane.f32.xlu1 %v671_v52 }
 0x3fc   : > { %v673_v9 = vpop.xlane.xlu1 %672 }
 0x3fd   : > { %v676_v10 = vsub.f32 %v673_v9, %v675_v8 }
 0x3ff   : > { %v677_v11 = vmul.f32 0.03125, %v676_v10  ;;  %v1510_v10 = vld [vmem:[%s2335_s5 + $0x1] ss:$0 sm:$0xff] }
 0x401   : > { %v678_v12 = vadd.f32 1e-12, %v677_v11 }
 0x403   : > { %1839 = vrsqrt.f32 %v678_v12  ;;  %v1511_v12 = vld [vmem:[%s2336_s6 + $0x1] ss:$0 sm:$0xff] }
 0x410   : > { %v1840_v13 = vpop.eup %1839 }
 0x411   : > { %v680_v15 = vmul.f32 %v1840_v13, %v670_v51 }
 0x413   : > { %v687_v17 = vmul.f32 %v1479_v14, %v680_v15  ;;  %v1821_v15 = vld [vmem:[%s2337_s7 + $0x78] sm:$0xff]  }
 0x415   : > { %v694_v18 = vadd.f32 %v1480_v16, %v687_v17 }
 0x417   : > { %v711_v19 = vpack.c.bf16 %v694_v18, %v694_v18 }
 0x419   : > { %1682 = vmatmul.mubr.bf16.vlgmr.msra.gmra.mxu0 %v711_v19 }
 0x41a   : > { %1707 = vmatprep.mubr.msk.f32.mxu0 %vm443_vm0, %v2032_v0 }
 0x4d9   : > { %v801_v23 = vpop.f32.mrf.mxu0 }
 0x4da   : > { %v802_v0 = vadd.f32 %v1481_v22, %v801_v23  ;;  %v1824_v22 = vld [vmem:[%s2337_s7 + $0x60] sm:$0xff]   ;;  %v1825_v23 = vld [vmem:[%s2337_s7 + $0x58] sm:$0xff]  }
 0x4db   : > { %v1683_v24 = vpop.f32.mrf.mxu0 }
 0x4dc   : > { %v807_v25 = vmax.f32 %v802_v0, 0.0  ;;  %v1826_v0 = vld [vmem:[%s2337_s7 + $0x50] sm:$0xff]   ;;  %v1827_v24 = vld [vmem:[%s2337_s7 + $0x48] sm:$0xff]  }
 0x4dd   : > { %v804_v26 = vpop.f32.mrf.mxu0 }
 0x4de   : > { %v824_v27 = vpack.c.bf16 %v807_v25, %v807_v25  ;;  %v1828_v25 = vld [vmem:[%s2337_s7 + $0x40] sm:$0xff]   ;;  %v1829_v26 = vld [vmem:[%s2339_s9 + $0x78] sm:$0xff]  }
 0x4df   : > { %v1684_v29 = vpop.f32.mrf.mxu0 }
 0x4e0   : > { %1702 = vmatmul.mubr.bf16.vlgmr.msra.gmra.mxu1 %v824_v27  ;;  %v1830_v27 = vld [vmem:[%s2339_s9 + $0x70] sm:$0xff]   ;;  %v1831_v29 = vld [vmem:[%s2339_s9 + $0x68] sm:$0xff]  }
 0x4e1   : > { %1721 = vmatprep.mubr.msk.f32.mxu1 %vm1908_vm1, %v1907_v5 }
 0x5a0   : > { %v914_v31 = vpop.f32.mrf.mxu1 }
 0x5a1   : > { %v915_v32 = vadd.f32 %v1490_v30, %v914_v31  ;;  %v1832_v30 = vld [vmem:[%s2339_s9 + $0x60] sm:$0xff]   ;;  %v1833_v31 = vld [vmem:[%s2339_s9 + $0x58] sm:$0xff]  }
 0x5a2   : > { %v1703_v33 = vpop.f32.mrf.mxu1 }
 0x5a3   : > { %v920_v34 = vadd.f32 %v915_v32, %v2092_v47  ;;  %v1834_v32 = vld [vmem:[%s2339_s9 + $0x50] sm:$0xff]  }
 0x5a4   : > { %v917_v35 = vpop.f32.mrf.mxu1 }
 0x5a5   : > { %1705 = vmatprep.subr.mxu0 %v920_v34 }
 0x5a6   : > { %v1704_v36 = vpop.f32.mrf.mxu1  ;;  %1706 = vmatpush3.msra.mxu0 %v920_v34 }
 0x5a7   : > { %1708 = vmatmul.mubr.msk.f32.vlgmr.msra.gmra.mxu0 %vm443_vm0, %v2040_v1  ;;  %1724 = vmatprep.subr.bf16.mxu0 %v1907_v5  ;;  %v1588_v1 = vld [vmem:[%s2333_s3 + $0x8] sm:$0xff]  }
 0x5a8   : > { %1710 = vmatprep.mubr.msk.f32.mxu0 %vm443_vm0, %v2048_v2  ;;  %v1583_v41 = vunpack.c.h.bf16 %v1588_v1  ;;  %v1582_v44 = vunpack.c.l.bf16 %v1588_v1  ;;  %1725 = vmatpush3.bf16.msra.mxu0 %v1821_v15 }
 0x5a9   : > { %1726 = vmatprep.subr.bf16.mxu0 %v1907_v5 }
 0x5ab   : > { %1711 = vmatmul.mubr.msk.f32.gmra.mxu0 %vm443_vm0, %v2053_v4 }
 0x5ac   : > { %1740 = vmatprep.mubr.msk.bf16.mxu0 %vm1908_vm1, %v1907_v5  ;;  %1727 = vmatpush3.bf16.msra.mxu0 %v1822_v20 }
 0x5ad   : > { %1728 = vmatprep.subr.bf16.mxu0 %v1907_v5 }
 0x5b0   : > { %1729 = vmatpush3.bf16.msra.mxu0 %v1823_v21 }
 0x5b1   : > { %1730 = vmatprep.subr.bf16.mxu0 %v1907_v5 }
 0x5b4   : > { %1731 = vmatpush3.bf16.msra.mxu0 %v1824_v22 }
 0x5b5   : > { %1732 = vmatprep.subr.bf16.mxu0 %v1907_v5 }
 0x5b8   : > { %1733 = vmatpush3.bf16.msra.mxu0 %v1825_v23 }
 0x5b9   : > { %1734 = vmatprep.subr.bf16.mxu0 %v1907_v5 }
 0x5bc   : > { %1735 = vmatpush3.bf16.msra.mxu0 %v1826_v0 }
 0x5bd   : > { %1736 = vmatprep.subr.bf16.mxu0 %v1907_v5 }
 0x5c0   : > { %1737 = vmatpush3.bf16.msra.mxu0 %v1827_v24 }
 0x5c1   : > { %1738 = vmatprep.subr.bf16.mxu0 %v1907_v5 }
 0x5c4   : > { %1739 = vmatpush3.bf16.msra.mxu0 %v1828_v25 }
 0x667   : > { %v1709_v38 = vpop.f32.mrf.mxu0 }
 0x668   : > { %v1023_v43 = vmul.f32 %v1709_v38, %v1587_v39  ;;  %v1017_v50 = vmul.f32 %v1709_v38, %v1583_v41 }
 0x669   : > { %v987_v40 = vpop.f32.mrf.mxu0 }
 0x66a   : > { %v1022_v46 = vmul.f32 %v1586_v42, %v987_v40  ;;  %v1016_v53 = vmul.f32 %v1582_v44, %v987_v40 }
 0x66b   : > { %v1712_v2 = vpop.f32.mrf.mxu0 }
 0x66c   : > { %v1025_v4 = vmul.f32 %v1712_v2, %v1583_v41  ;;  %v1019_v47 = vmul.f32 %v1712_v2, %v1587_v39  ;;  %v1514_v39 = vld [vmem:[%s2341_s11 + $0x1] ss:$0 sm:$0xff] }
 0x66d   : > { %v997_v45 = vpop.f32.mrf.mxu0  ;;  %v1515_v41 = vld [vmem:[%s2342_s12 + $0x1] ss:$0 sm:$0xff] }
 0x66e   : > { %v1027_v48 = vadd.f32 %v1025_v4, %v1023_v43  ;;  %v1024_v49 = vmul.f32 %v1582_v44, %v997_v45  ;;  %v1018_v51 = vmul.f32 %v1586_v42, %v997_v45  ;;  %v1021_v54 = vsub.f32 %v1017_v50, %v1019_v47  ;;  %v1835_v44 = vld [vmem:[%s2339_s9 + $0x48] sm:$0xff]   ;;  %v1836_v4 = vld [vmem:[%s2339_s9 + $0x40] sm:$0xff]  }
 0x66f   : > { %v1533_v45 = vld [vmem:[%s2338_s8 + $0x1] ss:$0 sm:$0xff] }
 0x670   : > { %v1026_v52 = vadd.f32 %v1024_v49, %v1022_v46  ;;  %1714 = vmatpush3.msra.mxu1 %v1027_v48  ;;  %v1020_v55 = vsub.f32 %v1016_v53, %v1018_v51 }
 0x671   : > { %1715 = vmatprep.subr.mxu1 %v1907_v5 }
 0x672   : > { %1716 = vmatpush3.msra.mxu1 %v1026_v52 }
 0x673   : > { %1717 = vmatprep.subr.mxu1 %v1907_v5 }
 0x674   : > { %1718 = vmatpush3.msra.mxu1 %v1021_v54 }
 0x675   : > { %1719 = vmatprep.subr.mxu1 %v1907_v5 }
 0x676   : > { %1720 = vmatpush3.msra.mxu1 %v1020_v55 }
 0x677   : > { %1722 = vmatmul.mubr.msk.f32.vlgmr.msra.gmra.mxu1 %vm561_vm2, %v2078_v28  ;;  %1744 = vmatprep.subr.bf16.mxu1 %v1907_v5 }
 0x678   : > { %1760 = vmatprep.mubr.msk.bf16.mxu1 %vm1908_vm1, %v1907_v5  ;;  %1745 = vmatpush3.bf16.msra.mxu1 %v1829_v26 }
 0x679   : > { %1746 = vmatprep.subr.bf16.mxu1 %v1907_v5 }
 0x67c   : > { %1747 = vmatpush3.bf16.msra.mxu1 %v1830_v27 }
 0x67d   : > { %1748 = vmatprep.subr.bf16.mxu1 %v1907_v5 }
 0x680   : > { %1749 = vmatpush3.bf16.msra.mxu1 %v1831_v29 }
 0x681   : > { %1750 = vmatprep.subr.bf16.mxu1 %v1907_v5 }
 0x684   : > { %1751 = vmatpush3.bf16.msra.mxu1 %v1832_v30 }
 0x685   : > { %1752 = vmatprep.subr.bf16.mxu1 %v1907_v5 }
 0x688   : > { %1753 = vmatpush3.bf16.msra.mxu1 %v1833_v31 }
 0x689   : > { %1754 = vmatprep.subr.bf16.mxu1 %v1907_v5 }
 0x68c   : > { %1755 = vmatpush3.bf16.msra.mxu1 %v1834_v32 }
 0x68d   : > { %1756 = vmatprep.subr.bf16.mxu1 %v1907_v5 }
 0x690   : > { %1757 = vmatpush3.bf16.msra.mxu1 %v1835_v44 }
 0x691   : > { %1758 = vmatprep.subr.bf16.mxu1 %v1907_v5  ;;  %v1559_v5 = vld [vmem:[%s2340_s10 + $0x1] ss:$0 sm:$0xff] }
 0x694   : > { %1759 = vmatpush3.bf16.msra.mxu1 %v1836_v4 }
 0x737   : > { %v1094_v56 = vpop.f32.mrf.mxu1 }
 0x738   : > { %v1095_v57 = vadd.f32 %v1094_v56, %v920_v34 }
 0x739   : > { %v1723_v58 = vpop.f32.mrf.mxu1 }
 0x73a   : > { %1102 = vadd.xlane.f32.xlu0 %v1095_v57 }
 0x7c3   : > { %v1103_v59 = vpop.xlane.xlu0 %1102 }
 0x7c4   : > { %v1104_v60 = vmul.f32 0.03125, %v1103_v59 }
 0x7c6   : > { %v1105_v61 = vsub.f32 %v1095_v57, %v1104_v60  ;;  %v1109_v63 = vmul.f32 %v1104_v60, %v1104_v60 }
 0x7c8   : > { %v1106_v62 = vmul.f32 %v1105_v61, %v1105_v61  ;;  %v1110_v3 = vmul.f32 96.0, %v1109_v63 }
 0x7ca   : > { %1107 = vadd.xlane.f32.xlu1 %v1106_v62 }
 0x853   : > { %v1108_v6 = vpop.xlane.xlu1 %1107 }
 0x854   : > { %v1111_v7 = vsub.f32 %v1108_v6, %v1110_v3 }
 0x856   : > { %v1112_v8 = vmul.f32 0.03125, %v1111_v7 }
 0x858   : > { %v1113_v28 = vadd.f32 1e-12, %v1112_v8 }
 0x85a   : > { %1841 = vrsqrt.f32 %v1113_v28 }
 0x867   : > { %v1842_v9 = vpop.eup %1841 }
 0x868   : > { %v1115_v11 = vmul.f32 %v1842_v9, %v1105_v61 }
 0x86a   : > { %v1122_v13 = vmul.f32 %v1510_v10, %v1115_v11 }
 0x86c   : > { %v2205_v14 = vadd.f32 %v1511_v12, %v1122_v13 }
 0x86e   : > { %1134 = vadd.xlane.f32.xlu0 %v2205_v14 }
 0x8f7   : > { %v1135_v16 = vpop.xlane.xlu0 %1134 }
 0x8f8   : > { %v1136_v17 = vmul.f32 0.03125, %v1135_v16 }
 0x8fa   : > { %v1137_v18 = vsub.f32 %v2205_v14, %v1136_v17  ;;  %v1141_v33 = vmul.f32 %v1136_v17, %v1136_v17 }
 0x8fc   : > { %v1138_v19 = vmul.f32 %v1137_v18, %v1137_v18  ;;  %v1142_v34 = vmul.f32 96.0, %v1141_v33 }
 0x8fe   : > { %1139 = vadd.xlane.f32.xlu1 %v1138_v19 }
 0x987   : > { %v1140_v35 = vpop.xlane.xlu1 %1139 }
 0x988   : > { %v1143_v36 = vsub.f32 %v1140_v35, %v1142_v34 }
 0x98a   : > { %v1144_v37 = vmul.f32 0.03125, %v1143_v36 }
 0x98c   : > { %v1145_v38 = vadd.f32 1e-12, %v1144_v37 }
 0x98e   : > { %1843 = vrsqrt.f32 %v1145_v38 }
 0x99b   : > { %v1844_v1 = vpop.eup %1843 }
 0x99c   : > { %v1147_v40 = vmul.f32 %v1844_v1, %v1137_v18 }
 0x99e   : > { %v1154_v42 = vmul.f32 %v1514_v39, %v1147_v40 }
 0x9a0   : > { %v1161_v2 = vadd.f32 %v1515_v41, %v1154_v42 }
 0x9a2   : > { %v1179_v43 = vpack.c.bf16 %v1161_v2, %v1161_v2 }
 0x9a4   : > { %1741 = vmatmul.mubr.bf16.vlgmr.msra.gmra.mxu0 %v1179_v43 }
 0xa64   : > { %v1270_v46 = vpop.f32.mrf.mxu0 }
 0xa65   : > { %v1271_v47 = vadd.f32 %v1533_v45, %v1270_v46 }
 0xa66   : > { %v1742_v48 = vpop.f32.mrf.mxu0 }
 0xa67   : > { %v1276_v49 = vmax.f32 %v1271_v47, 0.0 }
 0xa68   : > { %v1273_v50 = vpop.f32.mrf.mxu0 }
 0xa69   : > { %v1294_v51 = vpack.c.bf16 %v1276_v49, %v1276_v49 }
 0xa6a   : > { %v1743_v52 = vpop.f32.mrf.mxu0 }
 0xa6b   : > { %1761 = vmatmul.mubr.bf16.vlgmr.msra.gmra.mxu1 %v1294_v51 }
 0xb2b   : > { %v1385_v53 = vpop.f32.mrf.mxu1 }
 0xb2c   : > { %v1386_v54 = vadd.f32 %v1559_v5, %v1385_v53 }
 0xb2d   : > { %v1762_v55 = vpop.f32.mrf.mxu1 }
 0xb2e   : > { %v1391_v56 = vadd.f32 %v1386_v54, %v2205_v14 }
 0xb2f   : > { %v1388_v57 = vpop.f32.mrf.mxu1 }
 0xb30   : > { %1392 = vst [vmem:[%s431_s17] sm:$0xff] %v1391_v56 }
 0xb31   : > { %v1763_v58 = vpop.f32.mrf.mxu1 }
 0xb32   : > { %1858 = shalt.err (!%p1855_p3)
}
 0xb33   : > { %s1859_s14 = scalar_lea.hbm %s2289_s30, 128  ;;  %s1863_s23 = scalar_lea.hbm %s2343_s13, 256 }
 0xb34   : > { %p1860_p4 = scmp.ne.s32.totalorder %s2289_s30, %s1859_s14  ;;  %p1864_p9 = scmp.lt.s32.totalorder %s2289_s30, %s2343_s13 }
 0xb35   : > { %p1865_p10 = scmp.lt.s32.totalorder %s1863_s23, %s1859_s14 }
 0xb36   : > { %p1861_p7 = pnand %p1860_p4, %p2018_p5 }
 0xb37   : > { %p1866_p11 = por %p1865_p10, %p1864_p9 }
 0xb38   : > { %p1862_p8 = pneg %p1861_p7 }
 0xb3a   : > { %p1867_p12 = pnand %p1866_p11, %p1862_p8 }
 0xb3c   : > { %1870 = shalt.err (!%p1867_p12)
}
 0xb3d   : > { %1764 = dma.vmem_to_hbm [thread:$0]  (%p2018_p5), %s2291_s22, 128, %s2289_s30, %s1394_s29  }
 0xb3e PF: > { %p1770_p13 = scmp.ge.s32.totalorder %s1905_s28, 2  ;;  %s1419_s15 = sand.u32 1, %s1893_s25  }
 0xb3f   : > { %s1420_s21 = scalar_lea.sflag [#allocation3], %s1419_s15 }
 0xb40   : > { %p1767_p0 = pnand %p1770_p13, %p2022_p6 }
 0xb42   : > { %p1768_p1 = pneg %p1767_p0 }
 0xb44   : > { %1888 = dma.done.wait (%p1768_p1), %s1420_s21, 128  }
 0xb45   : > { %1890 = vsyncadd (%p1768_p1), %s1420_s21, 4294967168  ;;  %s2352_s28 = sld [smem:[#allocation6_spill]]  ;;  %s2355_s25 = smov %s1897_s26 }
 0xb46   : > { %s2353_s27 = sld [smem:[#allocation5_spill]] }
 0xb47   : > { %s2354_s14 = sld [smem:[#allocation7_spill]] }
 0xb4b   : > { %p23_p2 = scmp.ge.s32.totalorder %s2352_s28, 4  }
 0xb4c   : > { %s2356_s26 = smov %s2353_s27 }
 0xb4d   : > { %s2357_s27 = smov %s2354_s14  ;;  %25 = sbr.rel (!%p23_p2) target bundleno = 3 (0x3), region = 117 }
 0xb52   :  { %1425 = vsyncpa [#allocation3], 1 }
 0xb53   :  { %1427 = vsyncpa [#allocation3 + $0x1], 1 }

</bundles_post_ra>
